<compile_context>
chip_gen: v7x
topology: tpu7x:2x2x1
jax: 0.10.0
libtpu: 0.0.40
codegen_flags: <defaults>
</compile_context>

<pallas_src>
import functools

import jax
import jax.numpy as jnp
import numpy as np
from jax import lax
from jax.experimental import pallas as pl
from jax.experimental.pallas import tpu as pltpu

_LANE = 128
_PAD_L = 8          # sublane-aligned start column of the live interior


# ---------------------------------------------------------------------------
# small helpers (plain-JAX glue)
# ---------------------------------------------------------------------------
def _round_up(n, m=_LANE):
    return ((n + m - 1) // m) * m


def _pad_to(a, shape):
    """Zero-pad `a` up to `shape` (per-dim trailing padding)."""
    pads = [(0, t - s) for s, t in zip(a.shape, shape)]
    return jnp.pad(a, pads) if any(p[1] for p in pads) else a


def _fold_conv_bn(w, g, b, m, v, eps):
    """Fold eval-mode BatchNorm into a bias-free conv.

    w: (cout, cin, kh, kw).  Returns weight (kh*kw, cin, cout) and bias (cout,).
    """
    s = g / jnp.sqrt(v + eps)
    wf = (w * s[:, None, None, None]).astype(jnp.float32)
    kh, kw = w.shape[2], w.shape[3]
    wf = jnp.transpose(wf, (2, 3, 1, 0)).reshape(kh * kw, w.shape[1], w.shape[0])
    return wf, (b - m * s).astype(jnp.float32)


# ---------------------------------------------------------------------------
# Kernel 1: mhsa=False variant  (cv1 1x1 -> cv2 3x3 -> +x),  H-tiled grid
# ---------------------------------------------------------------------------
def _btc_conv_kernel(x_ref, w1_ref, b1_ref, w2_ref, b2_ref, o_ref,
                     pad_ref, acc_ref, *, add):
    # x_ref  : (TH+2, W, C1p) bf16  input tile incl. 1-row halo top/bottom
    # w1_ref : (C1p, C_p)     bf16  folded 1x1 conv weight
    # b1_ref : (1, C_p)       f32   folded bias
    # w2_ref : (9, C_p, C2p)  bf16  folded 3x3 conv weight (taps row-major)
    # b2_ref : (1, C2p)       f32   folded bias
    # o_ref  : (TH, W, C2p)   f32   output tile
    # pad_ref: (TH+2, W+_PAD_L+1, C_p) bf16 scratch.  Live interior = columns
    #          [_PAD_L, _PAD_L+W) (sublane aligned); zero border columns at
    #          _PAD_L-1 and _PAD_L+W.
    # acc_ref: (TH*W, C2p)    f32   tap accumulator (VMEM, not vregs)
    thp2, w, c1p = x_ref.shape
    th = thp2 - 2
    c_p = w1_ref.shape[1]
    c2p = w2_ref.shape[2]
    L = _PAD_L

    xb = x_ref[...]                                   # bf16, loaded once

    # ---- cv1: 1x1 conv (per-pixel matmul) + folded BN + SiLU ---------------
    y1 = jnp.dot(xb.reshape(thp2 * w, c1p), w1_ref[...],
                 preferred_element_type=jnp.float32) + b1_ref[...]
    y1 = y1 * jax.nn.sigmoid(y1)                      # SiLU, f32 epilogue

    # ---- stage cv1 output into the W-padded scratch (bf16) -----------------
    # Zero only the two 1-wide border columns (cheap, safe under megacore
    # sharding); the interior is fully overwritten every step.
    pad_ref[:, L - 1:L, :] = jnp.zeros((thp2, 1, c_p), pad_ref.dtype)
    pad_ref[:, L + w:L + w + 1, :] = jnp.zeros((thp2, 1, c_p), pad_ref.dtype)
    pad_ref[:, L:L + w, :] = y1.reshape(thp2, w, c_p).astype(pad_ref.dtype)

    # Halo rows that fall outside the image must hold the *zero padding of the
    # cv1 output*, not cv1(0) (= SiLU(folded bias)).
    @pl.when(pl.program_id(1) == 0)
    def _():                                          # first H tile: top halo
        pad_ref[0:1, L:L + w, :] = jnp.zeros((1, w, c_p), pad_ref.dtype)

    @pl.when(pl.program_id(1) == pl.num_programs(1) - 1)
    def _():                                          # last H tile: bottom halo
        pad_ref[th + 1:th + 2, L:L + w, :] = jnp.zeros((1, w, c_p), pad_ref.dtype)

    # ---- cv2: 3x3 conv = 3 column-shifted views x 3 free row slices --------
    # Bias folded into the accumulator init; accumulate in VMEM scratch.
    acc_ref[...] = jnp.broadcast_to(b2_ref[...], acc_ref.shape)
    for dj in range(3):                 # column shift: one sublane-shifted load
        col = pad_ref[:, L - 1 + dj:L - 1 + dj + w, :]        # (TH+2, W, C_p)
        for di in range(3):             # row shift: free slice along major dim
            win = col[di:di + th].reshape(th * w, c_p)
            acc_ref[...] += jnp.dot(win, w2_ref[3 * di + dj],
                                    preferred_element_type=jnp.float32)

    y2 = acc_ref[...]
    y2 = y2 * jax.nn.sigmoid(y2)                      # SiLU, f32 epilogue
    if add:                                           # residual
        y2 = y2 + xb[1:th + 1].reshape(th * w, c1p).astype(jnp.float32)
    o_ref[...] = y2.reshape(th, w, c2p).astype(o_ref.dtype)


def bottleneck_transformer_conv_nhwc(x, cv1_p, cv2_p, *, shortcut_add,
                                     eps=1e-5, tile_h=8):
    """mhsa=False variant.  x: (N, H, W, C1) NHWC -> (N, H, W, C2) f32 NHWC.

    For stacks of blocks keep activations NHWC (and lane-padded) end to end and
    call this entry point directly — no per-block NCHW<->NHWC transposes.
    """
    n, h_dim, w_dim, c1 = x.shape
    w1, g1, b1, m1, v1 = cv1_p
    w2, g2, b2, m2, v2 = cv2_p
    c_ = w1.shape[0]
    c2 = w2.shape[0]
    add = bool(shortcut_add and c1 == c2)

    # fold BN (eval mode, running stats) into the conv weights / bias.
    w1f, b1f = _fold_conv_bn(w1, g1, b1, m1, v1, eps)      # (1, c1, c_), (c_,)
    w2f, b2f = _fold_conv_bn(w2, g2, b2, m2, v2, eps)      # (9, c_, c2), (c2,)

    # lane-dense channel padding (multiples of 128) + bf16 MXU operands.
    c1p, c_p, c2p = _round_up(c1), _round_up(c_), _round_up(c2)
    w1p = _pad_to(w1f[0], (c1p, c_p)).astype(jnp.bfloat16)
    b1p = _pad_to(b1f[None, :], (1, c_p))
    w2p = _pad_to(w2f, (9, c_p, c2p)).astype(jnp.bfloat16)
    b2p = _pad_to(b2f[None, :], (1, c2p))

    # Spatial H tiling with a 1-row halo.  The halo is materialised by the
    # wrapper (one extra pass over x, ~(TH+2)/TH duplication) so every grid
    # step is a plain rectangular block and keeps the automatic double-buffered
    # pipeline.  Best perf when H % tile_h == 0 and W % 8 == 0.
    th = tile_h if (h_dim % tile_h == 0) else h_dim
    ht = h_dim // th
    xp = _pad_to(x, (n, h_dim, w_dim, c1p)).astype(jnp.bfloat16)
    xh = jnp.pad(xp, ((0, 0), (1, 1), (0, 0), (0, 0)))     # zero H-halo source
    xh = jnp.stack([xh[:, i * th:i * th + th + 2] for i in range(ht)], axis=1)
    xh = xh.reshape(n * ht, th + 2, w_dim, c1p)

    kernel = functools.partial(_btc_conv_kernel, add=add)
    out = pl.pallas_call(
        kernel,
        out_shape=jax.ShapeDtypeStruct((n, h_dim, w_dim, c2p), jnp.float32),
        grid_spec=pltpu.PrefetchScalarGridSpec(
            num_scalar_prefetch=0,
            grid=(n, ht),
            in_specs=[
                pl.BlockSpec((pl.Squeezed(), th + 2, w_dim, c1p),
                             lambda i, j: (i * ht + j, 0, 0, 0)),
                pl.BlockSpec((c1p, c_p), lambda i, j: (0, 0)),
                pl.BlockSpec((1, c_p), lambda i, j: (0, 0)),
                pl.BlockSpec((9, c_p, c2p), lambda i, j: (0, 0, 0)),
                pl.BlockSpec((1, c2p), lambda i, j: (0, 0)),
            ],
            out_specs=pl.BlockSpec((pl.Squeezed(), th, w_dim, c2p),
                                   lambda i, j: (i, j, 0, 0)),
            scratch_shapes=[
                pltpu.VMEM((th + 2, w_dim + _PAD_L + 1, c_p), jnp.bfloat16),
                pltpu.VMEM((th * w_dim, c2p), jnp.float32),
            ],
        ),
        compiler_params=pltpu.CompilerParams(
            dimension_semantics=("parallel", "parallel"),
            vmem_limit_bytes=48 * 1024 * 1024),
    )(xh, w1p, b1p, w2p, b2p)
    return out[..., :c2]


def bottleneck_transformer_conv(x_nchw, cv1_p, cv2_p, *, eps=1e-5, tile_h=8):
    """NCHW adapter (PyTorch parity) around the NHWC kernel."""
    c1 = x_nchw.shape[1]
    c2 = cv2_p[0].shape[0]
    y = bottleneck_transformer_conv_nhwc(
        jnp.transpose(x_nchw, (0, 2, 3, 1)), cv1_p, cv2_p,
        shortcut_add=(c1 == c2), eps=eps, tile_h=tile_h)
    return jnp.transpose(y, (0, 3, 1, 2))


# ---------------------------------------------------------------------------
# Kernel 2: mhsa=True variant  (cv1 1x1 -> MHSA -> +x), one batch / grid step
# ---------------------------------------------------------------------------
def _btc_mhsa_kernel(x_ref, w1_ref, b1_ref, wq_ref, bq_ref, wk_ref, bk_ref,
                     wv_ref, bv_ref, o_ref, *, heads, head_dim, add):
    # x_ref: (H, W, C1p) bf16; weights (.., Cp) bf16; biases (1, Cp) f32.
    h_dim, w_dim, c1p = x_ref.shape
    cp = w1_ref.shape[1]
    hw = h_dim * w_dim
    d = head_dim

    xb = x_ref[...]
    x2d = xb.reshape(hw, c1p)

    # ---- cv1: 1x1 conv + folded BN + SiLU ----------------------------------
    y1 = jnp.dot(x2d, w1_ref[...],
                 preferred_element_type=jnp.float32) + b1_ref[...]
    y1 = y1 * jax.nn.sigmoid(y1)
    y1b = y1.astype(jnp.bfloat16)

    # ---- q / k / v 1x1 convs (with bias) -----------------------------------
    q = jnp.dot(y1b, wq_ref[...], preferred_element_type=jnp.float32) + bq_ref[...]
    k = jnp.dot(y1b, wk_ref[...], preferred_element_type=jnp.float32) + bk_ref[...]
    v = jnp.dot(y1b, wv_ref[...], preferred_element_type=jnp.float32) + bv_ref[...]

    # ---- per-head attention (NOTE: the PyTorch MHSA has no 1/sqrt(d)) ------
    outs = []
    for hh in range(heads):
        lo = hh * d
        qh = q[:, lo:lo + d].astype(jnp.bfloat16)            # (HW, d)
        kh = k[:, lo:lo + d].astype(jnp.bfloat16)
        vh = v[:, lo:lo + d].astype(jnp.bfloat16)
        e = jnp.einsum('qd,kd->qk', qh, kh,
                       preferred_element_type=jnp.float32)   # (HW, HW)
        e = e - jnp.max(e, axis=-1, keepdims=True)
        p = jnp.exp(e)
        attn = p / jnp.sum(p, axis=-1, keepdims=True)
        outs.append(jnp.einsum('qk,kd->qd', attn.astype(jnp.bfloat16), vh,
                               preferred_element_type=jnp.float32))
    if cp > heads * d:                       # lane padding beyond the real c2
        outs.append(jnp.zeros((hw, cp - heads * d), jnp.float32))
    att = jnp.concatenate(outs, axis=-1)                     # (HW, Cp)

    if add:
        att = att + x2d.astype(jnp.float32)
    o_ref[...] = att.reshape(h_dim, w_dim, cp).astype(o_ref.dtype)


def bottleneck_transformer_mhsa_nhwc(x, cv1_p, mhsa_p, *, heads, shortcut_add,
                                     eps=1e-5):
    """mhsa=True variant.  x: (N, H, W, C1) NHWC -> (N, H, W, C2) f32 NHWC."""
    n, h_dim, w_dim, c1 = x.shape
    w1, g1, b1, m1, v1 = cv1_p
    wq, bq, wk, bk, wv, bv = mhsa_p
    c2 = w1.shape[0]                   # expansion == 1: cv1 out == MHSA n_dims
    assert c2 % heads == 0
    d = c2 // heads
    add = bool(shortcut_add and c1 == c2)

    w1f, b1f = _fold_conv_bn(w1, g1, b1, m1, v1, eps)       # (1, c1, c2), (c2,)
    c1p, cp = _round_up(c1), _round_up(c2)
    w1p = _pad_to(w1f[0], (c1p, cp)).astype(jnp.bfloat16)
    b1p = _pad_to(b1f[None, :], (1, cp))

    def _prep(wc, bc):
        wt = wc[:, :, 0, 0].T.astype(jnp.float32)           # (cin, cout)
        return (_pad_to(wt, (cp, cp)).astype(jnp.bfloat16),
                _pad_to(bc.astype(jnp.float32)[None, :], (1, cp)))

    wqp, bqp = _prep(wq, bq)
    wkp, bkp = _prep(wk, bk)
    wvp, bvp = _prep(wv, bv)

    xp = _pad_to(x, (n, h_dim, w_dim, c1p)).astype(jnp.bfloat16)

    kernel = functools.partial(_btc_mhsa_kernel, heads=heads, head_dim=d,
                               add=add)
    out = pl.pallas_call(
        kernel,
        out_shape=jax.ShapeDtypeStruct((n, h_dim, w_dim, cp), jnp.float32),
        grid_spec=pltpu.PrefetchScalarGridSpec(
            num_scalar_prefetch=0,
            grid=(n,),
            in_specs=[
                pl.BlockSpec((pl.Squeezed(), h_dim, w_dim, c1p),
                             lambda i: (i, 0, 0, 0)),
                pl.BlockSpec((c1p, cp), lambda i: (0, 0)),
                pl.BlockSpec((1, cp), lambda i: (0, 0)),
                pl.BlockSpec((cp, cp), lambda i: (0, 0)),
                pl.BlockSpec((1, cp), lambda i: (0, 0)),
                pl.BlockSpec((cp, cp), lambda i: (0, 0)),
                pl.BlockSpec((1, cp), lambda i: (0, 0)),
                pl.BlockSpec((cp, cp), lambda i: (0, 0)),
                pl.BlockSpec((1, cp), lambda i: (0, 0)),
            ],
            out_specs=pl.BlockSpec((pl.Squeezed(), h_dim, w_dim, cp),
                                   lambda i: (i, 0, 0, 0)),
        ),
        compiler_params=pltpu.CompilerParams(
            dimension_semantics=("parallel",),
            vmem_limit_bytes=48 * 1024 * 1024),
    )(xp, w1p, b1p, wqp, bqp, wkp, bkp, wvp, bvp)
    return out[..., :c2]


def bottleneck_transformer_mhsa(x_nchw, cv1_p, mhsa_p, *, heads, eps=1e-5):
    """NCHW adapter (PyTorch parity) around the NHWC kernel."""
    c1 = x_nchw.shape[1]
    c2 = cv1_p[0].shape[0]
    y = bottleneck_transformer_mhsa_nhwc(
        jnp.transpose(x_nchw, (0, 2, 3, 1)), cv1_p, mhsa_p, heads=heads,
        shortcut_add=(c1 == c2), eps=eps)
    return jnp.transpose(y, (0, 3, 1, 2))


# ---------------------------------------------------------------------------
# Pure-JAX references (NCHW, module semantics).  `matmul_dtype=bfloat16`
# mirrors the kernel's bf16-operand / f32-accumulate precision policy.
# ---------------------------------------------------------------------------
def _q(a, dt):
    return a.astype(dt).astype(jnp.float32)


def ref_conv(x, cv1_p, cv2_p, *, eps=1e-5, matmul_dtype=jnp.float32):
    w1, g1, b1, m1, v1 = cv1_p
    w2, g2, b2, m2, v2 = cv2_p
    s1 = g1 / jnp.sqrt(v1 + eps)
    s2 = g2 / jnp.sqrt(v2 + eps)
    xq = _q(x, matmul_dtype)
    y = lax.conv_general_dilated(
        xq, _q(w1 * s1[:, None, None, None], matmul_dtype), (1, 1),
        [(0, 0), (0, 0)], dimension_numbers=('NCHW', 'OIHW', 'NCHW'))
    y = y + (b1 - m1 * s1)[None, :, None, None]
    y = y * jax.nn.sigmoid(y)
    z = lax.conv_general_dilated(
        _q(y, matmul_dtype), _q(w2 * s2[:, None, None, None], matmul_dtype),
        (1, 1), [(1, 1), (1, 1)], dimension_numbers=('NCHW', 'OIHW', 'NCHW'))
    z = z + (b2 - m2 * s2)[None, :, None, None]
    z = z * jax.nn.sigmoid(z)
    return xq + z if x.shape[1] == w2.shape[0] else z


def ref_mhsa(x, cv1_p, mhsa_p, *, heads, eps=1e-5, matmul_dtype=jnp.float32):
    w1, g1, b1, m1, v1 = cv1_p
    wq, bq, wk, bk, wv, bv = mhsa_p
    s1 = g1 / jnp.sqrt(v1 + eps)
    xq = _q(x, matmul_dtype)
    y = jnp.einsum('nchw,oc->nohw', xq,
                   _q(w1[:, :, 0, 0] * s1[:, None], matmul_dtype))
    y = y + (b1 - m1 * s1)[None, :, None, None]
    y = y * jax.nn.sigmoid(y)
    yq = _q(y, matmul_dtype)

    def proj(w, b):
        return jnp.einsum('nchw,oc->nohw', yq, _q(w[:, :, 0, 0], matmul_dtype)) \
            + b[None, :, None, None]

    q, k, v = proj(wq, bq), proj(wk, bk), proj(wv, bv)
    n, c, h, w = q.shape
    d = c // heads
    qh = _q(q.reshape(n, heads, d, h * w), matmul_dtype)
    kh = _q(k.reshape(n, heads, d, h * w), matmul_dtype)
    vh = _q(v.reshape(n, heads, d, h * w), matmul_dtype)
    e = jnp.einsum('nhdi,nhdj->nhij', qh, kh)         # no 1/sqrt(d), as in torch
    attn = jax.nn.softmax(e, axis=-1)
    o = jnp.einsum('nhij,nhdj->nhdi', _q(attn, matmul_dtype), vh)
    o = o.reshape(n, c, h, w)
    return xq + o if x.shape[1] == c else o


# ---------------------------------------------------------------------------
if __name__ == "__main__":
    ks = jax.random.split(jax.random.PRNGKey(0), 24)

    # ------------- mhsa=True path (module default) --------------------------
    N, C, H, W, HEADS = 2, 16, 8, 8, 4                 # c1 == c2 -> residual on
    x_a = jax.random.normal(ks[0], (N, C, H, W), jnp.float32)
    cv1_a = (0.3 * jax.random.normal(ks[1], (C, C, 1, 1), jnp.float32),
             1.0 + 0.1 * jax.random.normal(ks[2], (C,), jnp.float32),
             0.1 * jax.random.normal(ks[3], (C,), jnp.float32),
             0.1 * jax.random.normal(ks[4], (C,), jnp.float32),
             jnp.abs(1.0 + 0.1 * jax.random.normal(ks[5], (C,), jnp.float32)))
    mhsa_a = (0.3 * jax.random.normal(ks[6], (C, C, 1, 1), jnp.float32),
              0.05 * jax.random.normal(ks[7], (C,), jnp.float32),
              0.3 * jax.random.normal(ks[8], (C, C, 1, 1), jnp.float32),
              0.05 * jax.random.normal(ks[9], (C,), jnp.float32),
              0.3 * jax.random.normal(ks[10], (C, C, 1, 1), jnp.float32),
              0.05 * jax.random.normal(ks[11], (C,), jnp.float32))

    out_a = jax.block_until_ready(
        bottleneck_transformer_mhsa(x_a, cv1_a, mhsa_a, heads=HEADS))
    ref_a = ref_mhsa(x_a, cv1_a, mhsa_a, heads=HEADS, matmul_dtype=jnp.bfloat16)
    np.testing.assert_allclose(np.asarray(out_a), np.asarray(ref_a),
                               rtol=2e-2, atol=2e-2)

    # ------------- mhsa=False path (3x3 conv cv2) ----------------------------
    N2, C1, C2, H2, W2 = 2, 8, 8, 16, 16               # c1 == c2 -> residual on
    x_b = jax.random.normal(ks[12], (N2, C1, H2, W2), jnp.float32)
    cv1_b = (0.4 * jax.random.normal(ks[13], (C2, C1, 1, 1), jnp.float32),
             1.0 + 0.1 * jax.random.normal(ks[14], (C2,), jnp.float32),
             0.1 * jax.random.normal(ks[15], (C2,), jnp.float32),
             0.1 * jax.random.normal(ks[16], (C2,), jnp.float32),
             jnp.abs(1.0 + 0.1 * jax.random.normal(ks[17], (C2,), jnp.float32)))
    cv2_b = (0.2 * jax.random.normal(ks[18], (C2, C2, 3, 3), jnp.float32),
             1.0 + 0.1 * jax.random.normal(ks[19], (C2,), jnp.float32),
             0.1 * jax.random.normal(ks[20], (C2,), jnp.float32),
             0.1 * jax.random.normal(ks[21], (C2,), jnp.float32),
             jnp.abs(1.0 + 0.1 * jax.random.normal(ks[22], (C2,), jnp.float32)))

    out_b = jax.block_until_ready(
        bottleneck_transformer_conv(x_b, cv1_b, cv2_b, tile_h=8))
    ref_b = ref_conv(x_b, cv1_b, cv2_b, matmul_dtype=jnp.bfloat16)
    np.testing.assert_allclose(np.asarray(out_b), np.asarray(ref_b),
                               rtol=2e-2, atol=2e-2)

    print("KERNEL_OK")
</pallas_src>

<mosaic_0001>
module attributes {stable_mosaic.version = 11 : i64} {
  func.func @_btc_mhsa_kernel(%arg0: i32, %arg1: memref<1x8x8x128xbf16, #tpu.memory_space<vmem>>, %arg2: memref<128x128xbf16, #tpu.memory_space<vmem>>, %arg3: memref<1x128xf32, #tpu.memory_space<vmem>>, %arg4: memref<128x128xbf16, #tpu.memory_space<vmem>>, %arg5: memref<1x128xf32, #tpu.memory_space<vmem>>, %arg6: memref<128x128xbf16, #tpu.memory_space<vmem>>, %arg7: memref<1x128xf32, #tpu.memory_space<vmem>>, %arg8: memref<128x128xbf16, #tpu.memory_space<vmem>>, %arg9: memref<1x128xf32, #tpu.memory_space<vmem>>, %arg10: memref<1x8x8x128xf32, #tpu.memory_space<vmem>>) attributes {dimension_semantics = [#tpu.dimension_semantics<parallel>], iteration_bounds = array<i64: 2>, scalar_prefetch = 0 : i64, scratch_operands = 0 : i64, tpu.core_type = #tpu.core_type<tc>, window_params = [{transform_indices = @transform_0, window_bounds = array<i64: 1, 8, 8, 128>}, {pipeline_mode = #tpu.pipeline_mode<synchronous>, transform_indices = @transform_1, window_bounds = array<i64: 128, 128>}, {pipeline_mode = #tpu.pipeline_mode<synchronous>, transform_indices = @transform_2, window_bounds = array<i64: 1, 128>}, {pipeline_mode = #tpu.pipeline_mode<synchronous>, transform_indices = @transform_3, window_bounds = array<i64: 128, 128>}, {pipeline_mode = #tpu.pipeline_mode<synchronous>, transform_indices = @transform_4, window_bounds = array<i64: 1, 128>}, {pipeline_mode = #tpu.pipeline_mode<synchronous>, transform_indices = @transform_5, window_bounds = array<i64: 128, 128>}, {pipeline_mode = #tpu.pipeline_mode<synchronous>, transform_indices = @transform_6, window_bounds = array<i64: 1, 128>}, {pipeline_mode = #tpu.pipeline_mode<synchronous>, transform_indices = @transform_7, window_bounds = array<i64: 128, 128>}, {pipeline_mode = #tpu.pipeline_mode<synchronous>, transform_indices = @transform_8, window_bounds = array<i64: 1, 128>}, {transform_indices = @transform_9, window_bounds = array<i64: 1, 8, 8, 128>}]} {
    %c0 = arith.constant 0 : index
    %c0_0 = arith.constant 0 : index
    %c0_1 = arith.constant 0 : index
    %c0_2 = arith.constant 0 : index
    %0 = vector.load %arg1[%c0, %c0_0, %c0_1, %c0_2] : memref<1x8x8x128xbf16, #tpu.memory_space<vmem>>, vector<1x8x8x128xbf16>
    %1 = vector.shape_cast %0 : vector<1x8x8x128xbf16> to vector<8x8x128xbf16>
    %2 = vector.shape_cast %1 : vector<8x8x128xbf16> to vector<64x128xbf16>
    %c0_3 = arith.constant 0 : index
    %c0_4 = arith.constant 0 : index
    %3 = vector.load %arg2[%c0_3, %c0_4] : memref<128x128xbf16, #tpu.memory_space<vmem>>, vector<128x128xbf16>
    %cst = arith.constant dense<0.000000e+00> : vector<64x128xf32>
    %4 = tpu.matmul %2, %3, %cst {dimension_numbers = #tpu.dot_dimension_numbers<[1], [0], [0], [1], [0, 0, 1, 1], [], []>} : vector<64x128xbf16>, vector<128x128xbf16>, vector<64x128xf32> -> vector<64x128xf32>
    %c0_5 = arith.constant 0 : index
    %c0_6 = arith.constant 0 : index
    %5 = vector.load %arg3[%c0_5, %c0_6] : memref<1x128xf32, #tpu.memory_space<vmem>>, vector<1x128xf32>
    %6 = vector.broadcast %5 : vector<1x128xf32> to vector<64x128xf32>
    %7 = arith.addf %4, %6 : vector<64x128xf32>
    %8 = arith.negf %7 : vector<64x128xf32>
    %9 = math.exp %8 : vector<64x128xf32>
    %cst_7 = arith.constant 1.000000e+00 : f32
    %10 = vector.broadcast %cst_7 : f32 to vector<64x128xf32>
    %11 = arith.addf %10, %9 : vector<64x128xf32>
    %12 = arith.divf %10, %11 : vector<64x128xf32>
    %13 = arith.mulf %7, %12 : vector<64x128xf32>
    %14 = arith.truncf %13 : vector<64x128xf32> to vector<64x128xbf16>
    %c0_8 = arith.constant 0 : index
    %c0_9 = arith.constant 0 : index
    %15 = vector.load %arg4[%c0_8, %c0_9] : memref<128x128xbf16, #tpu.memory_space<vmem>>, vector<128x128xbf16>
    %cst_10 = arith.constant dense<0.000000e+00> : vector<64x128xf32>
    %16 = tpu.matmul %14, %15, %cst_10 {dimension_numbers = #tpu.dot_dimension_numbers<[1], [0], [0], [1], [0, 0, 1, 1], [], []>} : vector<64x128xbf16>, vector<128x128xbf16>, vector<64x128xf32> -> vector<64x128xf32>
    %c0_11 = arith.constant 0 : index
    %c0_12 = arith.constant 0 : index
    %17 = vector.load %arg5[%c0_11, %c0_12] : memref<1x128xf32, #tpu.memory_space<vmem>>, vector<1x128xf32>
    %18 = vector.broadcast %17 : vector<1x128xf32> to vector<64x128xf32>
    %19 = arith.addf %16, %18 : vector<64x128xf32>
    %c0_13 = arith.constant 0 : index
    %c0_14 = arith.constant 0 : index
    %20 = vector.load %arg6[%c0_13, %c0_14] : memref<128x128xbf16, #tpu.memory_space<vmem>>, vector<128x128xbf16>
    %cst_15 = arith.constant dense<0.000000e+00> : vector<64x128xf32>
    %21 = tpu.matmul %14, %20, %cst_15 {dimension_numbers = #tpu.dot_dimension_numbers<[1], [0], [0], [1], [0, 0, 1, 1], [], []>} : vector<64x128xbf16>, vector<128x128xbf16>, vector<64x128xf32> -> vector<64x128xf32>
    %c0_16 = arith.constant 0 : index
    %c0_17 = arith.constant 0 : index
    %22 = vector.load %arg7[%c0_16, %c0_17] : memref<1x128xf32, #tpu.memory_space<vmem>>, vector<1x128xf32>
    %23 = vector.broadcast %22 : vector<1x128xf32> to vector<64x128xf32>
    %24 = arith.addf %21, %23 : vector<64x128xf32>
    %c0_18 = arith.constant 0 : index
    %c0_19 = arith.constant 0 : index
    %25 = vector.load %arg8[%c0_18, %c0_19] : memref<128x128xbf16, #tpu.memory_space<vmem>>, vector<128x128xbf16>
    %cst_20 = arith.constant dense<0.000000e+00> : vector<64x128xf32>
    %26 = tpu.matmul %14, %25, %cst_20 {dimension_numbers = #tpu.dot_dimension_numbers<[1], [0], [0], [1], [0, 0, 1, 1], [], []>} : vector<64x128xbf16>, vector<128x128xbf16>, vector<64x128xf32> -> vector<64x128xf32>
    %c0_21 = arith.constant 0 : index
    %c0_22 = arith.constant 0 : index
    %27 = vector.load %arg9[%c0_21, %c0_22] : memref<1x128xf32, #tpu.memory_space<vmem>>, vector<1x128xf32>
    %28 = vector.broadcast %27 : vector<1x128xf32> to vector<64x128xf32>
    %29 = arith.addf %26, %28 : vector<64x128xf32>
    %30 = vector.extract_strided_slice %19 {offsets = [0, 0], sizes = [64, 4], strides = [1, 1]} : vector<64x128xf32> to vector<64x4xf32>
    %31 = arith.truncf %30 : vector<64x4xf32> to vector<64x4xbf16>
    %32 = vector.extract_strided_slice %24 {offsets = [0, 0], sizes = [64, 4], strides = [1, 1]} : vector<64x128xf32> to vector<64x4xf32>
    %33 = arith.truncf %32 : vector<64x4xf32> to vector<64x4xbf16>
    %34 = vector.extract_strided_slice %29 {offsets = [0, 0], sizes = [64, 4], strides = [1, 1]} : vector<64x128xf32> to vector<64x4xf32>
    %35 = arith.truncf %34 : vector<64x4xf32> to vector<64x4xbf16>
    "tpu.trace_start"() <{level = 10 : i32, message = "qd,kd->qk"}> : () -> ()
    %cst_23 = arith.constant dense<0.000000e+00> : vector<64x64xf32>
    %36 = tpu.matmul %31, %33, %cst_23 {dimension_numbers = #tpu.dot_dimension_numbers<[1], [1], [0], [0], [0, 0, 1, 0], [], []>} : vector<64x4xbf16>, vector<64x4xbf16>, vector<64x64xf32> -> vector<64x64xf32>
    "tpu.trace_stop"() : () -> ()
    %cst_24 = arith.constant dense<0xFF800000> : vector<64xf32>
    %37 = vector.multi_reduction <maximumf>, %36, %cst_24 [1] : vector<64x64xf32> to vector<64xf32>
    %38 = vector.shape_cast %37 : vector<64xf32> to vector<64x1xf32>
    %39 = vector.broadcast %38 : vector<64x1xf32> to vector<64x64xf32>
    %40 = arith.subf %36, %39 : vector<64x64xf32>
    %41 = math.exp %40 : vector<64x64xf32>
    %cst_25 = arith.constant dense<0.000000e+00> : vector<64xf32>
    %42 = vector.multi_reduction <add>, %41, %cst_25 [1] : vector<64x64xf32> to vector<64xf32>
    %43 = vector.shape_cast %42 : vector<64xf32> to vector<64x1xf32>
    %44 = vector.broadcast %43 : vector<64x1xf32> to vector<64x64xf32>
    %45 = arith.divf %41, %44 : vector<64x64xf32>
    %46 = arith.truncf %45 : vector<64x64xf32> to vector<64x64xbf16>
    "tpu.trace_start"() <{level = 10 : i32, message = "qk,kd->qd"}> : () -> ()
    %cst_26 = arith.constant dense<0.000000e+00> : vector<64x4xf32>
    %47 = tpu.matmul %46, %35, %cst_26 {dimension_numbers = #tpu.dot_dimension_numbers<[1], [0], [0], [1], [0, 0, 1, 1], [], []>} : vector<64x64xbf16>, vector<64x4xbf16>, vector<64x4xf32> -> vector<64x4xf32>
    "tpu.trace_stop"() : () -> ()
    %48 = vector.extract_strided_slice %19 {offsets = [0, 4], sizes = [64, 4], strides = [1, 1]} : vector<64x128xf32> to vector<64x4xf32>
    %49 = arith.truncf %48 : vector<64x4xf32> to vector<64x4xbf16>
    %50 = vector.extract_strided_slice %24 {offsets = [0, 4], sizes = [64, 4], strides = [1, 1]} : vector<64x128xf32> to vector<64x4xf32>
    %51 = arith.truncf %50 : vector<64x4xf32> to vector<64x4xbf16>
    %52 = vector.extract_strided_slice %29 {offsets = [0, 4], sizes = [64, 4], strides = [1, 1]} : vector<64x128xf32> to vector<64x4xf32>
    %53 = arith.truncf %52 : vector<64x4xf32> to vector<64x4xbf16>
    "tpu.trace_start"() <{level = 10 : i32, message = "qd,kd->qk"}> : () -> ()
    %cst_27 = arith.constant dense<0.000000e+00> : vector<64x64xf32>
    %54 = tpu.matmul %49, %51, %cst_27 {dimension_numbers = #tpu.dot_dimension_numbers<[1], [1], [0], [0], [0, 0, 1, 0], [], []>} : vector<64x4xbf16>, vector<64x4xbf16>, vector<64x64xf32> -> vector<64x64xf32>
    "tpu.trace_stop"() : () -> ()
    %cst_28 = arith.constant dense<0xFF800000> : vector<64xf32>
    %55 = vector.multi_reduction <maximumf>, %54, %cst_28 [1] : vector<64x64xf32> to vector<64xf32>
    %56 = vector.shape_cast %55 : vector<64xf32> to vector<64x1xf32>
    %57 = vector.broadcast %56 : vector<64x1xf32> to vector<64x64xf32>
    %58 = arith.subf %54, %57 : vector<64x64xf32>
    %59 = math.exp %58 : vector<64x64xf32>
    %cst_29 = arith.constant dense<0.000000e+00> : vector<64xf32>
    %60 = vector.multi_reduction <add>, %59, %cst_29 [1] : vector<64x64xf32> to vector<64xf32>
    %61 = vector.shape_cast %60 : vector<64xf32> to vector<64x1xf32>
    %62 = vector.broadcast %61 : vector<64x1xf32> to vector<64x64xf32>
    %63 = arith.divf %59, %62 : vector<64x64xf32>
    %64 = arith.truncf %63 : vector<64x64xf32> to vector<64x64xbf16>
    "tpu.trace_start"() <{level = 10 : i32, message = "qk,kd->qd"}> : () -> ()
    %cst_30 = arith.constant dense<0.000000e+00> : vector<64x4xf32>
    %65 = tpu.matmul %64, %53, %cst_30 {dimension_numbers = #tpu.dot_dimension_numbers<[1], [0], [0], [1], [0, 0, 1, 1], [], []>} : vector<64x64xbf16>, vector<64x4xbf16>, vector<64x4xf32> -> vector<64x4xf32>
    "tpu.trace_stop"() : () -> ()
    %66 = vector.extract_strided_slice %19 {offsets = [0, 8], sizes = [64, 4], strides = [1, 1]} : vector<64x128xf32> to vector<64x4xf32>
    %67 = arith.truncf %66 : vector<64x4xf32> to vector<64x4xbf16>
    %68 = vector.extract_strided_slice %24 {offsets = [0, 8], sizes = [64, 4], strides = [1, 1]} : vector<64x128xf32> to vector<64x4xf32>
    %69 = arith.truncf %68 : vector<64x4xf32> to vector<64x4xbf16>
    %70 = vector.extract_strided_slice %29 {offsets = [0, 8], sizes = [64, 4], strides = [1, 1]} : vector<64x128xf32> to vector<64x4xf32>
    %71 = arith.truncf %70 : vector<64x4xf32> to vector<64x4xbf16>
    "tpu.trace_start"() <{level = 10 : i32, message = "qd,kd->qk"}> : () -> ()
    %cst_31 = arith.constant dense<0.000000e+00> : vector<64x64xf32>
    %72 = tpu.matmul %67, %69, %cst_31 {dimension_numbers = #tpu.dot_dimension_numbers<[1], [1], [0], [0], [0, 0, 1, 0], [], []>} : vector<64x4xbf16>, vector<64x4xbf16>, vector<64x64xf32> -> vector<64x64xf32>
    "tpu.trace_stop"() : () -> ()
    %cst_32 = arith.constant dense<0xFF800000> : vector<64xf32>
    %73 = vector.multi_reduction <maximumf>, %72, %cst_32 [1] : vector<64x64xf32> to vector<64xf32>
    %74 = vector.shape_cast %73 : vector<64xf32> to vector<64x1xf32>
    %75 = vector.broadcast %74 : vector<64x1xf32> to vector<64x64xf32>
    %76 = arith.subf %72, %75 : vector<64x64xf32>
    %77 = math.exp %76 : vector<64x64xf32>
    %cst_33 = arith.constant dense<0.000000e+00> : vector<64xf32>
    %78 = vector.multi_reduction <add>, %77, %cst_33 [1] : vector<64x64xf32> to vector<64xf32>
    %79 = vector.shape_cast %78 : vector<64xf32> to vector<64x1xf32>
    %80 = vector.broadcast %79 : vector<64x1xf32> to vector<64x64xf32>
    %81 = arith.divf %77, %80 : vector<64x64xf32>
    %82 = arith.truncf %81 : vector<64x64xf32> to vector<64x64xbf16>
    "tpu.trace_start"() <{level = 10 : i32, message = "qk,kd->qd"}> : () -> ()
    %cst_34 = arith.constant dense<0.000000e+00> : vector<64x4xf32>
    %83 = tpu.matmul %82, %71, %cst_34 {dimension_numbers = #tpu.dot_dimension_numbers<[1], [0], [0], [1], [0, 0, 1, 1], [], []>} : vector<64x64xbf16>, vector<64x4xbf16>, vector<64x4xf32> -> vector<64x4xf32>
    "tpu.trace_stop"() : () -> ()
    %84 = vector.extract_strided_slice %19 {offsets = [0, 12], sizes = [64, 4], strides = [1, 1]} : vector<64x128xf32> to vector<64x4xf32>
    %85 = arith.truncf %84 : vector<64x4xf32> to vector<64x4xbf16>
    %86 = vector.extract_strided_slice %24 {offsets = [0, 12], sizes = [64, 4], strides = [1, 1]} : vector<64x128xf32> to vector<64x4xf32>
    %87 = arith.truncf %86 : vector<64x4xf32> to vector<64x4xbf16>
    %88 = vector.extract_strided_slice %29 {offsets = [0, 12], sizes = [64, 4], strides = [1, 1]} : vector<64x128xf32> to vector<64x4xf32>
    %89 = arith.truncf %88 : vector<64x4xf32> to vector<64x4xbf16>
    "tpu.trace_start"() <{level = 10 : i32, message = "qd,kd->qk"}> : () -> ()
    %cst_35 = arith.constant dense<0.000000e+00> : vector<64x64xf32>
    %90 = tpu.matmul %85, %87, %cst_35 {dimension_numbers = #tpu.dot_dimension_numbers<[1], [1], [0], [0], [0, 0, 1, 0], [], []>} : vector<64x4xbf16>, vector<64x4xbf16>, vector<64x64xf32> -> vector<64x64xf32>
    "tpu.trace_stop"() : () -> ()
    %cst_36 = arith.constant dense<0xFF800000> : vector<64xf32>
    %91 = vector.multi_reduction <maximumf>, %90, %cst_36 [1] : vector<64x64xf32> to vector<64xf32>
    %92 = vector.shape_cast %91 : vector<64xf32> to vector<64x1xf32>
    %93 = vector.broadcast %92 : vector<64x1xf32> to vector<64x64xf32>
    %94 = arith.subf %90, %93 : vector<64x64xf32>
    %95 = math.exp %94 : vector<64x64xf32>
    %cst_37 = arith.constant dense<0.000000e+00> : vector<64xf32>
    %96 = vector.multi_reduction <add>, %95, %cst_37 [1] : vector<64x64xf32> to vector<64xf32>
    %97 = vector.shape_cast %96 : vector<64xf32> to vector<64x1xf32>
    %98 = vector.broadcast %97 : vector<64x1xf32> to vector<64x64xf32>
    %99 = arith.divf %95, %98 : vector<64x64xf32>
    %100 = arith.truncf %99 : vector<64x64xf32> to vector<64x64xbf16>
    "tpu.trace_start"() <{level = 10 : i32, message = "qk,kd->qd"}> : () -> ()
    %cst_38 = arith.constant dense<0.000000e+00> : vector<64x4xf32>
    %101 = tpu.matmul %100, %89, %cst_38 {dimension_numbers = #tpu.dot_dimension_numbers<[1], [0], [0], [1], [0, 0, 1, 1], [], []>} : vector<64x64xbf16>, vector<64x4xbf16>, vector<64x4xf32> -> vector<64x4xf32>
    %cst_39 = arith.constant 0.000000e+00 : f32
    "tpu.trace_stop"() : () -> ()
    %102 = vector.broadcast %cst_39 : f32 to vector<64x112xf32>
    %103 = tpu.concatenate %47, %65, %83, %101, %102 in 1 : vector<64x4xf32>, vector<64x4xf32>, vector<64x4xf32>, vector<64x4xf32>, vector<64x112xf32> -> vector<64x128xf32>
    %104 = arith.extf %2 : vector<64x128xbf16> to vector<64x128xf32>
    %105 = arith.addf %103, %104 : vector<64x128xf32>
    %106 = vector.shape_cast %105 : vector<64x128xf32> to vector<8x8x128xf32>
    %c0_40 = arith.constant 0 : index
    %c0_41 = arith.constant 0 : index
    %c0_42 = arith.constant 0 : index
    %c0_43 = arith.constant 0 : index
    %107 = vector.load %arg10[%c0_40, %c0_41, %c0_42, %c0_43] : memref<1x8x8x128xf32, #tpu.memory_space<vmem>>, vector<1x8x8x128xf32>
    %108 = vector.shape_cast %107 : vector<1x8x8x128xf32> to vector<8x8x128xf32>
    %109 = vector.shape_cast %106 : vector<8x8x128xf32> to vector<1x8x8x128xf32>
    tpu.vector_store %arg10[%c0_40, %c0_41, %c0_42, %c0_43], %109 {strides = array<i32>} : memref<1x8x8x128xf32, #tpu.memory_space<vmem>>, vector<1x8x8x128xf32>,
    return
  }
  func.func @transform_0(%arg0: i32) -> (i32, i32, i32, i32) {
    %c0_i32 = arith.constant 0 : i32
    %c0_i32_0 = arith.constant 0 : i32
    %c0_i32_1 = arith.constant 0 : i32
    %c0_i32_2 = arith.constant 0 : i32
    return %arg0, %c0_i32, %c0_i32_0, %c0_i32_1 : i32, i32, i32, i32
  }
  func.func @transform_1(%arg0: i32) -> (i32, i32) {
    %c0_i32 = arith.constant 0 : i32
    %c0_i32_0 = arith.constant 0 : i32
    %c0_i32_1 = arith.constant 0 : i32
    return %c0_i32, %c0_i32_0 : i32, i32
  }
  func.func @transform_2(%arg0: i32) -> (i32, i32) {
    %c0_i32 = arith.constant 0 : i32
    %c0_i32_0 = arith.constant 0 : i32
    %c0_i32_1 = arith.constant 0 : i32
    return %c0_i32, %c0_i32_0 : i32, i32
  }
  func.func @transform_3(%arg0: i32) -> (i32, i32) {
    %c0_i32 = arith.constant 0 : i32
    %c0_i32_0 = arith.constant 0 : i32
    %c0_i32_1 = arith.constant 0 : i32
    return %c0_i32, %c0_i32_0 : i32, i32
  }
  func.func @transform_4(%arg0: i32) -> (i32, i32) {
    %c0_i32 = arith.constant 0 : i32
    %c0_i32_0 = arith.constant 0 : i32
    %c0_i32_1 = arith.constant 0 : i32
    return %c0_i32, %c0_i32_0 : i32, i32
  }
  func.func @transform_5(%arg0: i32) -> (i32, i32) {
    %c0_i32 = arith.constant 0 : i32
    %c0_i32_0 = arith.constant 0 : i32
    %c0_i32_1 = arith.constant 0 : i32
    return %c0_i32, %c0_i32_0 : i32, i32
  }
  func.func @transform_6(%arg0: i32) -> (i32, i32) {
    %c0_i32 = arith.constant 0 : i32
    %c0_i32_0 = arith.constant 0 : i32
    %c0_i32_1 = arith.constant 0 : i32
    return %c0_i32, %c0_i32_0 : i32, i32
  }
  func.func @transform_7(%arg0: i32) -> (i32, i32) {
    %c0_i32 = arith.constant 0 : i32
    %c0_i32_0 = arith.constant 0 : i32
    %c0_i32_1 = arith.constant 0 : i32
    return %c0_i32, %c0_i32_0 : i32, i32
  }
  func.func @transform_8(%arg0: i32) -> (i32, i32) {
    %c0_i32 = arith.constant 0 : i32
    %c0_i32_0 = arith.constant 0 : i32
    %c0_i32_1 = arith.constant 0 : i32
    return %c0_i32, %c0_i32_0 : i32, i32
  }
  func.func @transform_9(%arg0: i32) -> (i32, i32, i32, i32) {
    %c0_i32 = arith.constant 0 : i32
    %c0_i32_0 = arith.constant 0 : i32
    %c0_i32_1 = arith.constant 0 : i32
    %c0_i32_2 = arith.constant 0 : i32
    return %arg0, %c0_i32, %c0_i32_0, %c0_i32_1 : i32, i32, i32, i32
  }
}

</mosaic_0001>

<bundles_post_ra>
// kernel: tpu_custom_call.1
= control target key start
LH: loop header
LB: loop body
LE: loop exit
PB: predicated region body
PF: predicated region fallthrough
CT: control target
= control target key end

     0   :  { %s4284_s0 = inlined_call_operand.hbm [shape: bf16[2,8,8,128], index: 0, kind: input, shape index: {}]   ;;  %s4285_s1 = inlined_call_operand.hbm [shape: bf16[128,128], index: 1, kind: input, shape index: {}]   ;;  %s4286_s2 = inlined_call_operand.vmem [shape: f32[1,128], index: 2, kind: input, shape index: {}]   ;;  %s4287_s3 = inlined_call_operand.hbm [shape: bf16[128,128], index: 3, kind: input, shape index: {}]   ;;  %s4288_s4 = inlined_call_operand.vmem [shape: f32[1,128], index: 4, kind: input, shape index: {}]   ;;  %s4289_s5 = inlined_call_operand.hbm [shape: bf16[128,128], index: 5, kind: input, shape index: {}]   ;;  %s4290_s6 = inlined_call_operand.vmem [shape: f32[1,128], index: 6, kind: input, shape index: {}]   ;;  %s4291_s7 = inlined_call_operand.hbm [shape: bf16[128,128], index: 7, kind: input, shape index: {}]   ;;  %s4292_s8 = inlined_call_operand.vmem [shape: f32[1,128], index: 8, kind: input, shape index: {}]   ;;  %s4293_s9 = inlined_call_operand.hbm [shape: f32[2,8,8,128], index: 9, kind: output, shape index: {}]  }
   0x1   :  { %4300 = sst [smem:[#allocation18_spill]] %s4293_s9 }
   0x2   :  { %14 = vsyncpa [#allocation3], 0 }
   0x3   :  { %16 = vsyncpa [#allocation3 + $0x1], 0 }
   0x4   :  { %17 = vsyncpa [#allocation6], 0 }
   0x5   :  { %18 = vsyncpa [#allocation9], 0 }
   0x6   :  { %19 = vsyncpa [#allocation4], 0 }
   0x7   :  { %21 = vsyncpa [#allocation4 + $0x1], 0  ;;  %s3507_s30 = smov 0   ;;  %s3509_s10 = smov 0  }
   0x8   :  { %s3511_s11 = smov 0   ;;  %s3513_s12 = smov 0  }
   0x9 LB: > { %4301 = sst [smem:[#allocation16_spill]] %s3428_s30  ;;  %s3528_s13 = sadd.s32 4294967295, %s3440_s12   ;;  %s3440_s12 = sphi %s3513_s12, %s4325_s12   ;;  %s3436_s11 = sphi %s3511_s11, %s4324_s11   ;;  %s3432_s10 = sphi %s3509_s10, %s4323_s10   ;;  %s3428_s30 = sphi %s3507_s30, %s4322_s30  }
   0xa   : > { %s2468_s14 = sadd.s32 4294967294, %s3440_s12   ;;  %p47_p0 = scmp.ne.s32.totalorder %s3432_s10, %s3428_s30 }
   0xb   : > { %p4294_p1 = scmp.eq.s32.totalorder %s3528_s13, 0  ;;  %p245_p3 = scmp.eq.s32.totalorder %s2468_s14, 1 }
   0xc   : > { %p2469_p5 = scmp.ge.s32.totalorder %s3440_s12, 1  ;;  %p252_p7 = scmp.lt.s32.totalorder %s3440_s12, 3 }
   0xd   : > { %p3537_p4 = por %p4294_p1, %p47_p0  ;;  %p3542_p6 = por %p245_p3, %p47_p0 }
   0xe   : > { %p3547_p8 = pnand %p2469_p5, %p252_p7  ;;  %s3442_s18 = smov [#allocation5]  }
   0xf   : > { %s4302_s15 = scalar_select %p3537_p4, 1, 0 }
  0x10   : > { %s4303_s16 = scalar_select %p3542_p6, 1, 0 }
  0x11   : > { %s4305_s17 = scalar_select %p3547_p8, 1, 0 }
  0x12   : > { %4304 = sst [smem:[#allocation17_spill]] %s4303_s16  ;;  %s264_s19 = sshll.u32 %s3442_s18, 4  ;;  %s3551_s19 = int_to_ptr.vmem [resolvable:$true] %s264_s19 }
  0x13   : > { %p2944_p9 = pneg %p3547_p8  ;;  %s3443_s21 = smov [#allocation8]  }
  0x14   : > { %s296_s22 = sshll.u32 %s3443_s21, 4  ;;  %s3444_s23 = smov [#allocation7]   ;;  %s3562_s22 = int_to_ptr.vmem [resolvable:$true] %s296_s22 }
  0x15   : > { %p3558_p11 = pnand %p2944_p9, %p4294_p1  ;;  %s3564_s24 = sshll.u32 %s3444_s23, 4  ;;  %s281_s24 = int_to_ptr.vmem [resolvable:$true] %s3564_s24 }
  0x16   : > { %s3224_s27 = scalar_lea.hbm %s4285_s1, 1024 }
  0x17   : > { %p3225_p12 = scmp.ne.s32.totalorder %s4285_s1, %s3224_s27  ;;  %p3574_p13 = pneg %p3558_p11 }
  0x18   : > { %p3231_p5 = scmp.lt.u32.totalorder %s3224_s27, %s4285_s1 }
  0x19   : > { %p3227_p0 = pnand %p3574_p13, %p3225_p12 }
  0x1b   : > { %p3228_p3 = pneg %p3227_p0 }
  0x1d   : > { %p3233_p7 = pnand %p3231_p5, %p3228_p3 }
  0x1f   : > { %3236 = shalt.err (!%p3233_p7)
}
  0x20   : > { %s3237_s23 = scalar_lea.vmem %s3551_s19, 1024  ;;  %p3245_p2 = scmp.lt.s32.totalorder %s3551_s19, %s3551_s19 }
  0x21   : > { %p3238_p9 = scmp.ne.s32.totalorder %s3551_s19, %s3237_s23  ;;  %p3246_p6 = scmp.lt.s32.totalorder %s3237_s23, %s3237_s23 }
  0x23   : > { %p3240_p10 = pnand %p3238_p9, %p3574_p13  ;;  %p3247_p12 = por %p3246_p6, %p3245_p2 }
  0x25   : > { %p3241_p1 = pneg %p3240_p10 }
  0x27   : > { %p3248_p0 = pnand %p3247_p12, %p3241_p1 }
  0x29   : > { %3251 = shalt.err (!%p3248_p0)
}
  0x2a   : > { %s3445_s25 = smov 64   ;;  %s3446_s26 = smov 4  }
  0x2b   : > { %2947 = dma.hbm_to_vmem [thread:$0]  (!%p3558_p11), %s4285_s1, 1024, %s3551_s19, [#allocation6], %s3445_s25, %s3445_s25, %s3446_s26  }
  0x2c   : > { %s3252_s21 = scalar_lea.hbm %s4289_s5, 1024 }
  0x2d   : > { %p3253_p1 = scmp.ne.s32.totalorder %s4289_s5, %s3252_s21  ;;  %p3259_p10 = scmp.lt.u32.totalorder %s3252_s21, %s4289_s5 }
  0x2f   : > { %p3255_p2 = pnand %p3253_p1, %p3574_p13 }
  0x31   : > { %p3256_p6 = pneg %p3255_p2 }
  0x33   : > { %p3261_p3 = pnand %p3259_p10, %p3256_p6 }
  0x35   : > { %3264 = shalt.err (!%p3261_p3)
}
  0x36   : > { %s3265_s19 = scalar_lea.vmem %s3562_s22, 1024  ;;  %p3273_p12 = scmp.lt.s32.totalorder %s3562_s22, %s3562_s22 }
  0x37   : > { %p3266_p5 = scmp.ne.s32.totalorder %s3562_s22, %s3265_s19  ;;  %p3274_p0 = scmp.lt.s32.totalorder %s3265_s19, %s3265_s19 }
  0x39   : > { %p3268_p7 = pnand %p3266_p5, %p3574_p13  ;;  %p3275_p1 = por %p3274_p0, %p3273_p12 }
  0x3b   : > { %p3269_p9 = pneg %p3268_p7 }
  0x3d   : > { %p3276_p2 = pnand %p3275_p1, %p3269_p9 }
  0x3f   : > { %3279 = shalt.err (!%p3276_p2)
}
  0x40   : > { %2953 = dma.hbm_to_vmem [thread:$0]  (!%p3558_p11), %s4289_s5, 1024, %s3562_s22, [#allocation9], %s3445_s25, %s3445_s25, %s3446_s26  }
  0x41   : > { %s3280_s28 = scalar_lea.hbm %s4287_s3, 1024 }
  0x42   : > { %p3281_p6 = scmp.ne.s32.totalorder %s4287_s3, %s3280_s28  ;;  %p3287_p5 = scmp.lt.u32.totalorder %s3280_s28, %s4287_s3 }
  0x44   : > { %p3283_p10 = pnand %p3281_p6, %p3574_p13 }
  0x46   : > { %p3284_p3 = pneg %p3283_p10 }
  0x48   : > { %p3289_p7 = pnand %p3287_p5, %p3284_p3 }
  0x4a   : > { %3292 = shalt.err (!%p3289_p7)
}
  0x4b   : > { %s3293_s19 = scalar_lea.vmem %s281_s24, 1024  ;;  %p3301_p1 = scmp.lt.s32.totalorder %s281_s24, %s281_s24 }
  0x4c   : > { %p3294_p9 = scmp.ne.s32.totalorder %s281_s24, %s3293_s19  ;;  %p3302_p2 = scmp.lt.s32.totalorder %s3293_s19, %s3293_s19 }
  0x4e   : > { %p3296_p12 = pnand %p3294_p9, %p3574_p13  ;;  %p3303_p4 = por %p3302_p2, %p3301_p1 }
  0x50   : > { %p3297_p0 = pneg %p3296_p12 }
  0x52   : > { %p3304_p8 = pnand %p3303_p4, %p3297_p0 }
  0x54   : > { %3307 = shalt.err (!%p3304_p8)
}
  0x55   : > { %2950 = dma.hbm_to_vmem [thread:$0]  (!%p3558_p11), %s4287_s3, 1024, %s281_s24, [#allocation6], %s3445_s25, %s3445_s25, %s3446_s26  }
  0x56   : > { %s3447_s30 = smov [#allocation10]   ;;  %s3308_s29 = scalar_lea.hbm %s4291_s7, 1024 }
  0x57   : > { %s312_s16 = sshll.u32 %s3447_s30, 4  ;;  %p3309_p4 = scmp.ne.s32.totalorder %s4291_s7, %s3308_s29  ;;  %s313_s16 = int_to_ptr.vmem [resolvable:$true] %s312_s16 }
  0x58   : > { %p3315_p10 = scmp.lt.u32.totalorder %s3308_s29, %s4291_s7 }
  0x59   : > { %p3311_p8 = pnand %p3309_p4, %p3574_p13 }
  0x5b   : > { %p3312_p6 = pneg %p3311_p8 }
  0x5d   : > { %p3317_p3 = pnand %p3315_p10, %p3312_p6 }
  0x5f   : > { %3320 = shalt.err (!%p3317_p3)
}
  0x60   : > { %s3321_s24 = scalar_lea.vmem %s313_s16, 1024  ;;  %p3329_p12 = scmp.lt.s32.totalorder %s313_s16, %s313_s16 }
  0x61   : > { %p3322_p5 = scmp.ne.s32.totalorder %s313_s16, %s3321_s24  ;;  %p3330_p0 = scmp.lt.s32.totalorder %s3321_s24, %s3321_s24 }
  0x63   : > { %p3324_p7 = pnand %p3322_p5, %p3574_p13  ;;  %p3331_p1 = por %p3330_p0, %p3329_p12 }
  0x65   : > { %p3325_p9 = pneg %p3324_p7 }
  0x67   : > { %p3332_p2 = pnand %p3331_p1, %p3325_p9 }
  0x69   : > { %3335 = shalt.err (!%p3332_p2)
}
  0x6a   : > { %2956 = dma.hbm_to_vmem [thread:$0]  (!%p3558_p11), %s4291_s7, 1024, %s313_s16, [#allocation9], %s3445_s25, %s3445_s25, %s3446_s26  }
  0x6b   : > { %s3668_s14 = sadd.s32 1, %s3440_s12   ;;  %s34_s20 = sadd.s32 1, %s3436_s11 }
  0x6c   : > { %s31_s30 = ssub.s32 %s3440_s12, %s3668_s14  ;;  %p41_p13 = scmp.ne.s32.totalorder %s3436_s11, %s3432_s10 }
  0x6d   : > { %p32_p4 = scmp.eq.s32.totalorder %s31_s30, 0  ;;  %p42_p8 = scmp.eq.s32.totalorder %s3440_s12, 0 }
  0x6e   : > { %p4308_p6 = scmp.eq.s32.totalorder %s3528_s13, 1  ;;  %p2969_p3 = scmp.lt.s32.totalorder %s3440_s12, 2 }
  0x6f   : > { %s3684_s28 = scalar_select %p32_p4, %s3436_s11, %s34_s20  }
  0x70   : > { %p3678_p10 = por %p4308_p6, %p41_p13  ;;  %p43_p5 = por %p42_p8, %p41_p13 }
  0x71   : > { %s329_s29 = sand.u32 1, %s3436_s11   ;;  %s2570_s16 = sshll.u32 %s3440_s12, 9 }
  0x72   : > { %s2475_s18 = sshll.u32 %s329_s29, 5  ;;  %s3691_s19 = scalar_lea.hbm %s4284_s0, %s2570_s16 }
  0x73   : > { %s333_s24 = scalar_lea.vmem [#allocation2], %s2475_s18  ;;  %p3695_p11 = pnand %p2969_p3, %p43_p5 }
  0x74   : > { %s340_s22 = sshll.u32 %s333_s24, 4  ;;  %s3699_s20 = scalar_lea.sflag [#allocation3], %s329_s29  ;;  %s3693_s22 = int_to_ptr.vmem [resolvable:$true] %s340_s22 }
  0x75   : > { %s3336_s30 = scalar_lea.hbm %s3691_s19, 512  ;;  %p3338_p9 = pneg %p3695_p11 }
  0x76   : > { %p3337_p7 = scmp.ne.s32.totalorder %s3691_s19, %s3336_s30  ;;  %s3341_s21 = scalar_lea.hbm %s4284_s0, 1024 }
  0x77   : > { %p3342_p1 = scmp.lt.u32.totalorder %s3691_s19, %s4284_s0  ;;  %p3343_p2 = scmp.lt.u32.totalorder %s3341_s21, %s3336_s30 }
  0x78   : > { %p3339_p12 = pnand %p3338_p9, %p3337_p7  ;;  %p3345_p4 = scmp.lt.u32.totalorder %s3336_s30, %s3691_s19 }
  0x79   : > { %p3344_p13 = por %p3343_p2, %p3342_p1 }
  0x7a   : > { %p3340_p0 = pneg %p3339_p12 }
  0x7b   : > { %p3346_p8 = por %p3345_p4, %p3344_p13 }
  0x7d   : > { %p3347_p6 = pnand %p3346_p8, %p3340_p0 }
  0x7f   : > { %3350 = shalt.err (!%p3347_p6)
}
  0x80   : > { %s3351_s29 = scalar_lea.vmem %s3693_s22, 512  ;;  %s3448_s18 = smov [#allocation2]  }
  0x81   : > { %p3352_p3 = scmp.ne.s32.totalorder %s3693_s22, %s3351_s29  ;;  %s3356_s16 = sshll.u32 %s3448_s18, 4  ;;  %s3357_s16 = int_to_ptr.vmem [resolvable:$false] %s3356_s16 }
  0x82   : > { %s3358_s23 = scalar_lea.vmem %s3357_s16, 1024  ;;  %p3359_p12 = scmp.lt.s32.totalorder %s3693_s22, %s3357_s16 }
  0x83   : > { %p3354_p5 = pnand %p3352_p3, %p3338_p9  ;;  %p3360_p1 = scmp.lt.s32.totalorder %s3358_s23, %s3351_s29 }
  0x85   : > { %p3355_p7 = pneg %p3354_p5  ;;  %p3361_p2 = por %p3360_p1, %p3359_p12 }
  0x87   : > { %p3362_p13 = pnand %p3361_p2, %p3355_p7 }
  0x89   : > { %3365 = shalt.err (!%p3362_p13)
}
  0x8a   : > { %2960 = dma.hbm_to_vmem [thread:$0]  (!%p3695_p11), %s3691_s19, 512, %s3693_s22, %s3699_s20, %s3445_s25, %s3445_s25, %s3446_s26  }
  0x8b   : > { %p4311_p9 = scmp.ne.s32.totalorder %s4305_s17, 0 }
  0x8c   : > { %s3733_s30 = sand.u32 (!%p4311_p9), 1, %s3432_s10   ;;  %p4312_p0 = scmp.ne.s32.totalorder (!%p4311_p9), %s4302_s15, 0 }
  0x8d   : > { %352 = sbr.rel (%p4311_p9) target bundleno = 3468 (0xd8c), region = 56  ;;  %s2479_s21 = sshll.u32 (!%p4311_p9), %s3733_s30, 5 }
  0x8e   : > { %s355_s24 = scalar_lea.sflag (!%p4311_p9), [#allocation3], %s3733_s30  ;;  %s3737_s29 = scalar_lea.vmem (!%p4311_p9), [#allocation2], %s2479_s21 }
  0x94   : > { %3411 = dma.done.wait (%p4312_p0), %s355_s24, 512  }
  0x95   : > { %3413 = vsyncadd (%p4312_p0), %s355_s24, 4294966784  ;;  %p4313_p11 = scmp.eq.s32.totalorder %s3528_s13, 0 }
  0x97   : > { %3415 = dma.done.wait (%p4313_p11), [#allocation6], 2048   ;;  %p4314_p4 = pmov %p4313_p11 }
  0x99   : > { %3417 = vsyncadd (%p4314_p4), [#allocation6], 4294965248  ;;  %p4315_p8 = pmov %p4314_p4 }
  0x9a   : > { %p4316_p6 = pmov %p4314_p4 }
  0x9b   : > { %3419 = dma.done.wait (%p4315_p8), [#allocation9], 2048  }
  0x9c   : > { %3421 = vsyncadd (%p4316_p6), [#allocation9], 4294965248  ;;  %v3020_v0 = vld [vmem:[#allocation5] sm:$0xff]   ;;  %v3021_v1 = vld [vmem:[#allocation5 + $0x8] sm:$0xff]   ;;  %vm1058_vm0 = vcmask 31744   ;;  %vm1148_vm1 = vcmask 523264  }
  0x9d   : > { %2684 = vmatprep.subr.bf16.mxu0 %v3020_v0  ;;  %v3022_v2 = vld [vmem:[#allocation5 + $0x10] sm:$0xff]   ;;  %v3023_v3 = vld [vmem:[#allocation5 + $0x18] sm:$0xff]   ;;  %v410_v4 = vld [vmem:[%s3737_s29] sm:$0xff]   ;;  %s3449_s18 = smov 124   ;;  %s3450_s16 = smov 120   ;;  %vm2301_vm2 = vcmask 97280  }
  0x9e   : > { %2685 = vmatpush3.bf16.msra.mxu0 %v3020_v0  ;;  %v3024_v5 = vld [vmem:[#allocation5 + $0x20] sm:$0xff]   ;;  %2700 = vmatprep.mubr.bf16.mxu0 %v410_v4  ;;  %v3025_v6 = vld [vmem:[#allocation5 + $0x28] sm:$0xff]   ;;  %v3026_v7 = vld [vmem:[#allocation5 + $0x30] sm:$0xff]   ;;  %s3451_s23 = smov 116   ;;  %s3452_s21 = smov 4   ;;  %vm2292_vm3 = vcmask 64512  }
  0x9f   : > { %2686 = vmatprep.subr.bf16.mxu0 %v3021_v1  ;;  %v3027_v8 = vld [vmem:[#allocation5 + $0x38] sm:$0xff]   ;;  %v412_v9 = vld [vmem:[%s3737_s29 + $0x8] sm:$0xff]   ;;  %v414_v10 = vld [vmem:[%s3737_s29 + $0x10] sm:$0xff]   ;;  %s3453_s24 = smov 8   ;;  %s3454_s15 = smov 12   ;;  %vm2310_vm4 = vcmask 130048  }
  0xa0   : > { %v416_v11 = vld [vmem:[%s3737_s29 + $0x18] sm:$0xff]   ;;  %v3032_v12 = vld [vmem:[#allocation7] sm:$0xff]   ;;  %v3034_v14 = vld [vmem:[#allocation7 + $0x8] sm:$0xff]   ;;  %s2484_s17 = sshll.u32 %s3733_s30, 6  ;;  %s2571_s26 = sshll.u32 %s3528_s13, 10 }
  0xa1   : > { %v3033_v13 = vld [vmem:[#allocation8] sm:$0xff]   ;;  %2708 = vmatprep.subr.bf16.mxu1 %v3032_v12  ;;  %v3035_v15 = vld [vmem:[#allocation8 + $0x8] sm:$0xff]   ;;  %v3036_v16 = vld [vmem:[#allocation7 + $0x10] sm:$0xff]   ;;  %s4193_s25 = scalar_lea.vmem [#allocation11], %s2484_s17  ;;  %s4317_s9 = sld [smem:[#allocation18_spill]] }
  0xa2   : > { %2687 = vmatpush3.bf16.msra.mxu0 %v3021_v1  ;;  %2709 = vmatpush3.bf16.msra.mxu1 %v3032_v12  ;;  %v3037_v17 = vld [vmem:[#allocation8 + $0x10] sm:$0xff]   ;;  %v3038_v18 = vld [vmem:[#allocation7 + $0x18] sm:$0xff]   ;;  %v3040_v20 = vld [vmem:[#allocation7 + $0x20] sm:$0xff]   ;;  %s2344_s13 = scalar_lea.sflag [#allocation4], %s3733_s30 }
  0xa3   : > { %2688 = vmatprep.subr.bf16.mxu0 %v3022_v2  ;;  %2710 = vmatprep.subr.bf16.mxu1 %v3034_v14  ;;  %v3039_v19 = vld [vmem:[#allocation8 + $0x18] sm:$0xff]   ;;  %v3041_v21 = vld [vmem:[#allocation8 + $0x20] sm:$0xff]   ;;  %v3042_v22 = vld [vmem:[#allocation7 + $0x28] sm:$0xff]  }
  0xa4   : > { %v3043_v23 = vld [vmem:[#allocation8 + $0x28] sm:$0xff]   ;;  %v3044_v24 = vld [vmem:[#allocation7 + $0x30] sm:$0xff]   ;;  %v3046_v26 = vld [vmem:[#allocation7 + $0x38] sm:$0xff]  }
  0xa5   : > { %v3045_v25 = vld [vmem:[#allocation8 + $0x30] sm:$0xff]   ;;  %v3047_v27 = vld [vmem:[#allocation8 + $0x38] sm:$0xff]   ;;  %v3755_v28 = vld [vmem:[#allocation10] sm:$0xff]  }
  0xa6   : > { %2689 = vmatpush3.bf16.msra.mxu0 %v3022_v2  ;;  %2711 = vmatpush3.bf16.msra.mxu1 %v3034_v14  ;;  %v2485_v29 = vld [vmem:[%s4286_s2] ss:$0 sm:$0xff] }
  0xa7   : > { %2690 = vmatprep.subr.bf16.mxu0 %v3023_v3  ;;  %2712 = vmatprep.subr.bf16.mxu1 %v3036_v16  ;;  %s4235_s20 = scalar_lea.hbm %s4317_s9, %s2571_s26 }
  0xaa   : > { %2691 = vmatpush3.bf16.msra.mxu0 %v3023_v3  ;;  %2713 = vmatpush3.bf16.msra.mxu1 %v3036_v16  ;;  %v3049_v16 = vld [vmem:[#allocation10 + $0x8] sm:$0xff]  }
  0xab   : > { %2692 = vmatprep.subr.bf16.mxu0 %v3024_v5  ;;  %2714 = vmatprep.subr.bf16.mxu1 %v3038_v18 }
  0xae   : > { %2693 = vmatpush3.bf16.msra.mxu0 %v3024_v5  ;;  %2715 = vmatpush3.bf16.msra.mxu1 %v3038_v18 }
  0xaf   : > { %2694 = vmatprep.subr.bf16.mxu0 %v3025_v6  ;;  %2716 = vmatprep.subr.bf16.mxu1 %v3040_v20 }
  0xb2   : > { %2695 = vmatpush3.bf16.msra.mxu0 %v3025_v6  ;;  %2717 = vmatpush3.bf16.msra.mxu1 %v3040_v20 }
  0xb3   : > { %2696 = vmatprep.subr.bf16.mxu0 %v3026_v7  ;;  %2718 = vmatprep.subr.bf16.mxu1 %v3042_v22 }
  0xb6   : > { %2697 = vmatpush3.bf16.msra.mxu0 %v3026_v7  ;;  %2719 = vmatpush3.bf16.msra.mxu1 %v3042_v22 }
  0xb7   : > { %2698 = vmatprep.subr.bf16.mxu0 %v3027_v8  ;;  %2720 = vmatprep.subr.bf16.mxu1 %v3044_v24 }
  0xba   : > { %2699 = vmatpush3.bf16.msra.mxu0 %v3027_v8  ;;  %2721 = vmatpush3.bf16.msra.mxu1 %v3044_v24 }
  0xbb   : > { %2732 = vmatprep.subr.bf16.mxu0 %v3033_v13  ;;  %2722 = vmatprep.subr.bf16.mxu1 %v3046_v26 }
  0xbd   : > { %2701 = vmatmul.mubr.bf16.vlgmr.msra.gmra.mrb[0].mxu0 %v412_v9 }
  0xbe   : > { %2704 = vmatprep.mubr.bf16.mxu0 %v414_v10  ;;  %2733 = vmatpush3.bf16.msra.mxu0 %v3033_v13 }
  0xbf   : > { %2734 = vmatprep.subr.bf16.mxu0 %v3035_v15  ;;  %2723 = vmatpush3.bf16.msra.mxu1 %v3046_v26 }
  0xc0   : > { %2756 = vmatprep.subr.bf16.mxu1 %v3755_v28 }
  0xc2   : > { %2735 = vmatpush3.bf16.msra.mxu0 %v3035_v15 }
  0xc3   : > { %2736 = vmatprep.subr.bf16.mxu0 %v3037_v17 }
  0xc5   : > { %2705 = vmatmul.mubr.bf16.gmra.mrb[4].mxu0 %v416_v11 }
  0xc6   : > { %2737 = vmatpush3.bf16.msra.mxu0 %v3037_v17 }
  0xc7   : > { %2738 = vmatprep.subr.bf16.mxu0 %v3039_v19 }
  0xca   : > { %2739 = vmatpush3.bf16.msra.mxu0 %v3039_v19 }
  0xcb   : > { %2740 = vmatprep.subr.bf16.mxu0 %v3041_v21 }
  0xce   : > { %2741 = vmatpush3.bf16.msra.mxu0 %v3041_v21 }
  0xcf   : > { %2742 = vmatprep.subr.bf16.mxu0 %v3043_v23 }
  0xd2   : > { %2743 = vmatpush3.bf16.msra.mxu0 %v3043_v23  ;;  %v3050_v23 = vld [vmem:[#allocation10 + $0x10] sm:$0xff]  }
  0xd3   : > { %2744 = vmatprep.subr.bf16.mxu0 %v3045_v25 }
  0xd6   : > { %2745 = vmatpush3.bf16.msra.mxu0 %v3045_v25 }
  0xd7   : > { %2746 = vmatprep.subr.bf16.mxu0 %v3047_v27 }
  0xda   : > { %2747 = vmatpush3.bf16.msra.mxu0 %v3047_v27 }
 0x190   : > { %v2702_v30 = vpop.f32.mrb[0].mxu0 }
 0x191   : > { %v556_v31 = vadd.f32 %v2702_v30, %v2485_v29  ;;  %v547_v32 = vpop.f32.mrb[1].mxu0  ;;  %v3053_v30 = vld [vmem:[#allocation10 + $0x28] sm:$0xff]  }
 0x192   : > { %v548_v33 = vadd.f32 %v2485_v29, %v547_v32  ;;  %v2703_v34 = vpop.f32.mrb[2].mxu0  ;;  %v3055_v32 = vld [vmem:[#allocation10 + $0x38] sm:$0xff]  }
 0x193   : > { %v2500_v35 = vmul.f32 -1.442695, %v556_v31  ;;  %v559_v36 = vadd.f32 %v2703_v34, %v2485_v29  ;;  %v550_v37 = vpop.f32.mrb[3].mxu0  ;;  %v2506_v34 = vld [vmem:[%s4288_s4] ss:$0 sm:$0xff] }
 0x194   : > { %v2498_v38 = vmul.f32 -1.442695, %v548_v33  ;;  %v551_v39 = vadd.f32 %v2485_v29, %v550_v37 }
 0x195   : > { %3060 = vpow2.f32 %v2500_v35  ;;  %v2501_v40 = vmul.f32 -1.442695, %v559_v36 }
 0x196   : > { %3062 = vpow2.f32 %v2498_v38  ;;  %v2499_v41 = vmul.f32 -1.442695, %v551_v39 }
 0x197   : > { %3064 = vpow2.f32 %v2501_v40 }
 0x198   : > { %3066 = vpow2.f32 %v2499_v41  ;;  %v2706_v42 = vpop.f32.mrb[4].mxu0 }
 0x199   : > { %v572_v43 = vadd.f32 %v2706_v42, %v2485_v29  ;;  %v563_v44 = vpop.f32.mrb[5].mxu0 }
 0x19a   : > { %v564_v45 = vadd.f32 %v2485_v29, %v563_v44  ;;  %v2707_v46 = vpop.f32.mrb[6].mxu0 }
 0x19b   : > { %v2504_v47 = vmul.f32 -1.442695, %v572_v43  ;;  %v575_v48 = vadd.f32 %v2707_v46, %v2485_v29  ;;  %v566_v49 = vpop.f32.mrb[7].mxu0 }
 0x19c   : > { %v2502_v50 = vmul.f32 -1.442695, %v564_v45  ;;  %v567_v51 = vadd.f32 %v2485_v29, %v566_v49  ;;  %v3051_v29 = vld [vmem:[#allocation10 + $0x18] sm:$0xff]  }
 0x19d   : > { %3068 = vpow2.f32 %v2504_v47  ;;  %v2505_v52 = vmul.f32 -1.442695, %v575_v48 }
 0x19e   : > { %3070 = vpow2.f32 %v2502_v50  ;;  %v2503_v53 = vmul.f32 -1.442695, %v567_v51 }
 0x19f   : > { %v3061_v54 = vpop.eup %3060  ;;  %3072 = vpow2.f32 %v2505_v52 }
 0x1a0   : > { %v3063_v55 = vpop.eup %3062  ;;  %v604_v56 = vadd.f32 1.0, %v3061_v54  ;;  %3074 = vpow2.f32 %v2503_v53 }
 0x1a1   : > { %v3065_v57 = vpop.eup %3064  ;;  %v602_v58 = vadd.f32 1.0, %v3063_v55 }
 0x1a2   : > { %v3067_v59 = vpop.eup %3066  ;;  %3076 = vrcp.f32 %v604_v56  ;;  %v605_v60 = vadd.f32 1.0, %v3065_v57 }
 0x1a3   : > { %3078 = vrcp.f32 %v602_v58  ;;  %v603_v61 = vadd.f32 1.0, %v3067_v59 }
 0x1a4   : > { %3080 = vrcp.f32 %v605_v60 }
 0x1a5   : > { %3082 = vrcp.f32 %v603_v61 }
 0x1a7   : > { %v3069_v62 = vpop.eup %3068 }
 0x1a8   : > { %v3071_v63 = vpop.eup %3070  ;;  %v608_v0 = vadd.f32 1.0, %v3069_v62 }
 0x1a9   : > { %v3073_v1 = vpop.eup %3072  ;;  %v606_v2 = vadd.f32 1.0, %v3071_v63 }
 0x1aa   : > { %v3075_v3 = vpop.eup %3074  ;;  %3084 = vrcp.f32 %v608_v0  ;;  %v609_v4 = vadd.f32 1.0, %v3073_v1 }
 0x1ab   : > { %3086 = vrcp.f32 %v606_v2  ;;  %v607_v5 = vadd.f32 1.0, %v3075_v3 }
 0x1ac   : > { %v3077_v6 = vpop.eup %3076  ;;  %3088 = vrcp.f32 %v609_v4 }
 0x1ad   : > { %v3079_v7 = vpop.eup %3078  ;;  %3090 = vrcp.f32 %v607_v5  ;;  %v628_v10 = vmul.f32 %v3077_v6, %v556_v31  ;;  %v3054_v31 = vld [vmem:[#allocation10 + $0x30] sm:$0xff]  }
 0x1ae   : > { %v3081_v8 = vpop.eup %3080  ;;  %v626_v12 = vmul.f32 %v3079_v7, %v548_v33 }
 0x1af   : > { %v3083_v9 = vpop.eup %3082  ;;  %v629_v11 = vmul.f32 %v3081_v8, %v559_v36  ;;  %v2515_v36 = vld [vmem:[%s4290_s6] ss:$0 sm:$0xff] }
 0x1b0   : > { %v627_v13 = vmul.f32 %v3083_v9, %v551_v39 }
 0x1b1   : > { %v635_v14 = vpack.c.bf16 %v629_v11, %v628_v10 }
 0x1b2   : > { %v634_v15 = vpack.c.bf16 %v627_v13, %v626_v12 }
 0x1b4   : > { %v3085_v17 = vpop.eup %3084  ;;  %2724 = vmatprep.mubr.bf16.mxu1 %v634_v15  ;;  %2748 = vmatprep.mubr.bf16.mxu0 %v634_v15 }
 0x1b5   : > { %v3087_v18 = vpop.eup %3086  ;;  %2725 = vmatmul.mubr.bf16.vlgmr.msra.gmra.mrb[0].mxu1 %v635_v14  ;;  %2749 = vmatmul.mubr.bf16.vlgmr.msra.gmra.mrb[8].mxu0 %v635_v14  ;;  %v632_v21 = vmul.f32 %v3085_v17, %v572_v43 }
 0x1b6   : > { %v3089_v19 = vpop.eup %3088  ;;  %2757 = vmatpush3.bf16.msra.mxu1 %v3755_v28  ;;  %v630_v24 = vmul.f32 %v3087_v18, %v564_v45  ;;  %v3052_v28 = vld [vmem:[#allocation10 + $0x20] sm:$0xff]  }
 0x1b7   : > { %v3091_v20 = vpop.eup %3090  ;;  %v633_v22 = vmul.f32 %v3089_v19, %v575_v48  ;;  %2758 = vmatprep.subr.bf16.mxu1 %v3049_v16 }
 0x1b8   : > { %v631_v25 = vmul.f32 %v3091_v20, %v567_v51 }
 0x1b9   : > { %v637_v26 = vpack.c.bf16 %v633_v22, %v632_v21 }
 0x1ba   : > { %2759 = vmatpush3.bf16.msra.mxu1 %v3049_v16  ;;  %v636_v27 = vpack.c.bf16 %v631_v25, %v630_v24 }
 0x1bb   : > { %2760 = vmatprep.subr.bf16.mxu1 %v3050_v23 }
 0x1bc   : > { %2728 = vmatprep.mubr.bf16.mxu1 %v636_v27  ;;  %2752 = vmatprep.mubr.bf16.mxu0 %v636_v27 }
 0x1bd   : > { %2729 = vmatmul.mubr.bf16.gmra.mrb[4].mxu1 %v637_v26  ;;  %2753 = vmatmul.mubr.bf16.gmra.mrb[12].mxu0 %v637_v26 }
 0x1be   : > { %2761 = vmatpush3.bf16.msra.mxu1 %v3050_v23  ;;  %2772 = vmatprep.mubr.bf16.mxu1 %v634_v15  ;;  %v2524_v15 = vld [vmem:[%s4292_s8] ss:$0 sm:$0xff] }
 0x1bf   : > { %2762 = vmatprep.subr.bf16.mxu1 %v3051_v29 }
 0x1c2   : > { %2763 = vmatpush3.bf16.msra.mxu1 %v3051_v29 }
 0x1c3   : > { %2764 = vmatprep.subr.bf16.mxu1 %v3052_v28 }
 0x1c6   : > { %2765 = vmatpush3.bf16.msra.mxu1 %v3052_v28 }
 0x1c7   : > { %2766 = vmatprep.subr.bf16.mxu1 %v3053_v30 }
 0x1ca   : > { %2767 = vmatpush3.bf16.msra.mxu1 %v3053_v30 }
 0x1cb   : > { %2768 = vmatprep.subr.bf16.mxu1 %v3054_v31 }
 0x1ce   : > { %2769 = vmatpush3.bf16.msra.mxu1 %v3054_v31 }
 0x1cf   : > { %2770 = vmatprep.subr.bf16.mxu1 %v3055_v32 }
 0x1d2   : > { %2771 = vmatpush3.bf16.msra.mxu1 %v3055_v32 }
 0x1d5   : > { %2773 = vmatmul.mubr.bf16.vlgmr.msra.gmra.mrb[8].mxu1 %v635_v14 }
 0x1d6   : > { %2776 = vmatprep.mubr.bf16.mxu1 %v636_v27 }
 0x1dd   : > { %2777 = vmatmul.mubr.bf16.gmra.mrb[12].mxu1 %v637_v26 }
 0x288   : > { %v2726_v33 = vpop.f32.mrb[0].mxu1  ;;  %v2750_v35 = vpop.f32.mrb[8].mxu0 }
 0x289   : > { %v743_v37 = vpop.f32.mrb[1].mxu1  ;;  %v879_v38 = vpop.f32.mrb[9].mxu0  ;;  %v752_v41 = vadd.f32 %v2726_v33, %v2506_v34  ;;  %v888_v42 = vadd.f32 %v2750_v35, %v2515_v36 }
 0x28a   : > { %v2727_v39 = vpop.f32.mrb[2].mxu1  ;;  %v2751_v40 = vpop.f32.mrb[10].mxu0  ;;  %v744_v47 = vadd.f32 %v2506_v34, %v743_v37  ;;  %v880_v48 = vadd.f32 %v2515_v36, %v879_v38 }
 0x28b   : > { %v755_v43 = vadd.f32 %v2727_v39, %v2506_v34  ;;  %v891_v44 = vadd.f32 %v2751_v40, %v2515_v36  ;;  %v746_v45 = vpop.f32.mrb[3].mxu1  ;;  %v882_v46 = vpop.f32.mrb[11].mxu0 }
 0x28c   : > { %v747_v49 = vadd.f32 %v2506_v34, %v746_v45  ;;  %v883_v50 = vadd.f32 %v2515_v36, %v882_v46 }
 0x28d   : > { %v3768_v51 = vpack.c.bf16 %v755_v43, %v752_v41  ;;  %v3770_v52 = vpack.c.bf16 %v891_v44, %v888_v42 }
 0x28e   : > { %v3772_v53 = vpack.c.bf16 %v747_v49, %v744_v47  ;;  %v3774_v54 = vpack.c.bf16 %v883_v50, %v880_v48 }
 0x28f   : > { %v1075_v12 = vsel %vm1058_vm0, %v3770_v52, 0 }
 0x290   : > { %v2730_v55 = vpop.f32.mrb[4].mxu1  ;;  %v2754_v56 = vpop.f32.mrb[12].mxu0  ;;  %2908 = vmatprep.subr.msk.bf16.mxu0 %vm1058_vm0, %v3774_v54  ;;  %2788 = vmatprep.mubr.msk.bf16.mxu0 %vm1058_vm0, %v3772_v53  ;;  %v1072_v57 = vsel %vm1058_vm0, %v3774_v54, 0 }
 0x291   : > { %v759_v58 = vpop.f32.mrb[5].mxu1  ;;  %v895_v59 = vpop.f32.mrb[13].mxu0  ;;  %2781 = vmatpush3.bf16.xpose.msra.mxu0 %v1072_v57  ;;  %v768_v62 = vadd.f32 %v2730_v55, %v2506_v34  ;;  %v904_v63 = vadd.f32 %v2754_v56, %v2515_v36 }
 0x292   : > { %v2731_v60 = vpop.f32.mrb[6].mxu1  ;;  %v2755_v61 = vpop.f32.mrb[14].mxu0  ;;  %2909 = vmatprep.subr.msk.bf16.mxu0 %vm1058_vm0, %v3770_v52  ;;  %v760_v4 = vadd.f32 %v2506_v34, %v759_v58  ;;  %v896_v5 = vadd.f32 %v2515_v36, %v895_v59 }
 0x293   : > { %v771_v0 = vadd.f32 %v2731_v60, %v2506_v34  ;;  %v907_v1 = vadd.f32 %v2755_v61, %v2515_v36  ;;  %v762_v2 = vpop.f32.mrb[7].mxu1  ;;  %v898_v3 = vpop.f32.mrb[15].mxu0 }
 0x294   : > { %v763_v6 = vadd.f32 %v2506_v34, %v762_v2  ;;  %v899_v7 = vadd.f32 %v2515_v36, %v898_v3 }
 0x295   : > { %v3784_v8 = vpack.c.bf16 %v771_v0, %v768_v62  ;;  %v3786_v9 = vpack.c.bf16 %v907_v1, %v904_v63 }
 0x296   : > { %v3788_v10 = vpack.c.bf16 %v763_v6, %v760_v4  ;;  %v3790_v11 = vpack.c.bf16 %v899_v7, %v896_v5 }
 0x297   : > { %v1081_v16 = vsel %vm1058_vm0, %v3786_v9, 0 }
 0x298   : > { %v1078_v13 = vsel %vm1058_vm0, %v3790_v11, 0 }
 0x299   : > { %2783 = vmatpush3.bf16.xpose.msra.mxu0 %v1075_v12 }
 0x29a   : > { %2910 = vmatprep.subr.msk.bf16.mxu0 %vm1058_vm0, %v3790_v11 }
 0x2a1   : > { %2785 = vmatpush3.bf16.xpose.msra.mxu0 %v1078_v13 }
 0x2a2   : > { %2911 = vmatprep.subr.msk.bf16.mxu0 %vm1058_vm0, %v3786_v9 }
 0x2a8   : > { %v2774_v14 = vpop.f32.mrb[8].mxu1 }
 0x2a9   : > { %v1015_v17 = vpop.f32.mrb[9].mxu1  ;;  %2787 = vmatpush3.bf16.xpose.msra.mxu0 %v1081_v16  ;;  %v1024_v19 = vadd.f32 %v2774_v14, %v2524_v15 }
 0x2aa   : > { %v2775_v18 = vpop.f32.mrb[10].mxu1  ;;  %v1016_v22 = vadd.f32 %v2524_v15, %v1015_v17 }
 0x2ab   : > { %v1027_v20 = vadd.f32 %v2775_v18, %v2524_v15  ;;  %v1018_v21 = vpop.f32.mrb[11].mxu1 }
 0x2ac   : > { %v1019_v23 = vadd.f32 %v2524_v15, %v1018_v21 }
 0x2ad   : > { %v3805_v24 = vpack.c.bf16 %v1027_v20, %v1024_v19 }
 0x2ae   : > { %v3807_v25 = vpack.c.bf16 %v1019_v23, %v1016_v22 }
 0x2b0   : > { %v2778_v26 = vpop.f32.mrb[12].mxu1  ;;  %2796 = vmatprep.subr.bf16.mxu1 %v3807_v25  ;;  %2789 = vmatmul.mubr.msk.bf16.vlgmr.msra.gmra.mrb[16].mxu0 %vm1058_vm0, %v3768_v51 }
 0x2b1   : > { %v1031_v27 = vpop.f32.mrb[13].mxu1  ;;  %2797 = vmatpush3.bf16.msra.mxu1 %v3807_v25  ;;  %2792 = vmatprep.mubr.msk.bf16.mxu0 %vm1058_vm0, %v3788_v10  ;;  %v1040_v28 = vadd.f32 %v2778_v26, %v2524_v15 }
 0x2b2   : > { %v2779_v29 = vpop.f32.mrb[14].mxu1  ;;  %2798 = vmatprep.subr.bf16.mxu1 %v3805_v24  ;;  %v1032_v32 = vadd.f32 %v2524_v15, %v1031_v27 }
 0x2b3   : > { %v1043_v30 = vadd.f32 %v2779_v29, %v2524_v15  ;;  %v1034_v31 = vpop.f32.mrb[15].mxu1 }
 0x2b4   : > { %v1035_v33 = vadd.f32 %v2524_v15, %v1034_v31 }
 0x2b5   : > { %v3816_v34 = vpack.c.bf16 %v1043_v30, %v1040_v28  ;;  %2799 = vmatpush3.bf16.msra.mxu1 %v3805_v24 }
 0x2b6   : > { %v3819_v35 = vpack.c.bf16 %v1035_v33, %v1032_v32 }
 0x2b8   : > { %2800 = vmatprep.subr.bf16.mxu1 %v3819_v35  ;;  %2793 = vmatmul.mubr.msk.bf16.gmra.mrb[20].mxu0 %vm1058_vm0, %v3784_v8 }
 0x2b9   : > { %2801 = vmatpush3.bf16.msra.mxu1 %v3819_v35 }
 0x2ba   : > { %2802 = vmatprep.subr.bf16.mxu1 %v3816_v34 }
 0x2bd   : > { %2803 = vmatpush3.bf16.msra.mxu1 %v3816_v34 }
 0x383   : > { %v2790_v36 = vpop.f32.mrb[16].mxu0 }
 0x384   : > { %v1117_v37 = vpop.f32.mrb[17].mxu0  ;;  %v1155_v38 = vsel %vm1148_vm1, %v2790_v36, -inf }
 0x385   : > { %1156 = vmax.xlane.f32.xlu1 %v1155_v38  ;;  %v2791_v39 = vpop.f32.mrb[18].mxu0  ;;  %v1149_v40 = vsel %vm1148_vm1, %v1117_v37, -inf }
 0x386   : > { %1150 = vmax.xlane.f32.xlu0 %v1149_v40  ;;  %v1120_v41 = vpop.f32.mrb[19].mxu0  ;;  %v1158_v42 = vsel %vm1148_vm1, %v2791_v39, -inf }
 0x387   : > { %v1152_v43 = vsel %vm1148_vm1, %v1120_v41, -inf }
 0x389   : > { %1159 = vmax.xlane.f32.xlu1 %v1158_v42 }
 0x38a   : > { %1153 = vmax.xlane.f32.xlu0 %v1152_v43 }
 0x38b   : > { %v2794_v44 = vpop.f32.mrb[20].mxu0 }
 0x38c   : > { %v1133_v45 = vpop.f32.mrb[21].mxu0  ;;  %v1167_v50 = vsel %vm1148_vm1, %v2794_v44, -inf }
 0x38d   : > { %v2795_v46 = vpop.f32.mrb[22].mxu0  ;;  %v1161_v47 = vsel %vm1148_vm1, %v1133_v45, -inf }
 0x38e   : > { %1162 = vmax.xlane.f32.xlu0 %v1161_v47  ;;  %v1136_v48 = vpop.f32.mrb[23].mxu0  ;;  %v1170_v55 = vsel %vm1148_vm1, %v2795_v46, -inf }
 0x38f   : > { %v1164_v49 = vsel %vm1148_vm1, %v1136_v48, -inf }
 0x390   : > { %1165 = vmax.xlane.f32.xlu1 %v1164_v49 }
 0x392   : > { %1168 = vmax.xlane.f32.xlu0 %v1167_v50 }
 0x394   : > { %1171 = vmax.xlane.f32.xlu1 %v1170_v55 }
 0x412   : > { %v1157_v56 = vpop.xlane.xlu1 %1156 }
 0x413   : > { %v1175_v57 = vsub.f32 %v2790_v36, %v1157_v56  ;;  %v1151_v58 = vpop.xlane.xlu0 %1150 }
 0x414   : > { %v1173_v59 = vsub.f32 %v1117_v37, %v1151_v58 }
 0x415   : > { %v1185_v60 = vmul.f32 1.442695, %v1175_v57 }
 0x416   : > { %v1181_v61 = vmul.f32 1.442695, %v1173_v59  ;;  %v1160_v62 = vpop.xlane.xlu1 %1159 }
 0x417   : > { %3092 = vpow2.f32 %v1185_v60  ;;  %v1176_v63 = vsub.f32 %v2791_v39, %v1160_v62  ;;  %v1154_v0 = vpop.xlane.xlu0 %1153 }
 0x418   : > { %v1174_v1 = vsub.f32 %v1120_v41, %v1154_v0  ;;  %3094 = vpow2.f32 %v1181_v61 }
 0x419   : > { %v1187_v2 = vmul.f32 1.442695, %v1176_v63 }
 0x41a   : > { %v1183_v3 = vmul.f32 1.442695, %v1174_v1 }
 0x41b   : > { %3096 = vpow2.f32 %v1187_v2  ;;  %v1163_v4 = vpop.xlane.xlu0 %1162 }
 0x41c   : > { %3098 = vpow2.f32 %v1183_v3  ;;  %v1177_v5 = vsub.f32 %v1133_v45, %v1163_v4 }
 0x41d   : > { %v1166_v29 = vpop.xlane.xlu1 %1165 }
 0x41e   : > { %v1189_v13 = vmul.f32 1.442695, %v1177_v5  ;;  %v1178_v31 = vsub.f32 %v1136_v48, %v1166_v29 }
 0x41f   : > { %v1169_v6 = vpop.xlane.xlu0 %1168 }
 0x420   : > { %v1179_v7 = vsub.f32 %v2794_v44, %v1169_v6  ;;  %v1191_v33 = vmul.f32 1.442695, %v1178_v31 }
 0x421   : > { %v3093_v12 = vpop.eup %3092  ;;  %v1172_v28 = vpop.xlane.xlu1 %1171 }
 0x422   : > { %v1193_v14 = vmul.f32 1.442695, %v1179_v7  ;;  %v1203_v15 = vsel %vm1148_vm1, %v3093_v12, 0.0  ;;  %v3095_v16 = vpop.eup %3094  ;;  %v1180_v30 = vsub.f32 %v2795_v46, %v1172_v28 }
 0x423   : > { %1204 = vadd.xlane.f32.xlu0 %v1203_v15  ;;  %v1197_v18 = vsel %vm1148_vm1, %v3095_v16, 0.0 }
 0x424   : > { %3100 = vpow2.f32 %v1193_v14  ;;  %v1195_v32 = vmul.f32 1.442695, %v1180_v30 }
 0x425   : > { %v3097_v17 = vpop.eup %3096  ;;  %3102 = vpow2.f32 %v1189_v13 }
 0x426   : > { %v1206_v19 = vsel %vm1148_vm1, %v3097_v17, 0.0  ;;  %v3099_v20 = vpop.eup %3098  ;;  %3104 = vpow2.f32 %v1195_v32 }
 0x427   : > { %1198 = vadd.xlane.f32.xlu0 %v1197_v18  ;;  %1207 = vadd.xlane.f32.xlu1 %v1206_v19  ;;  %v1200_v21 = vsel %vm1148_vm1, %v3099_v20, 0.0  ;;  %3106 = vpow2.f32 %v1191_v33 }
 0x42b   : > { %1201 = vadd.xlane.f32.xlu1 %v1200_v21 }
 0x42e   : > { %v3839_v22 = vpop.eup %3100 }
 0x42f   : > { %v1215_v23 = vsel %vm1148_vm1, %v3839_v22, 0.0  ;;  %v3843_v26 = vpop.eup %3102 }
 0x430   : > { %1216 = vadd.xlane.f32.xlu0 %v1215_v23  ;;  %v1209_v27 = vsel %vm1148_vm1, %v3843_v26, 0.0  ;;  %v3105_v36 = vpop.eup %3104 }
 0x431   : > { %v1218_v37 = vsel %vm1148_vm1, %v3105_v36, 0.0  ;;  %v3107_v38 = vpop.eup %3106 }
 0x432   : > { %v1212_v39 = vsel %vm1148_vm1, %v3107_v38, 0.0 }
 0x434   : > { %1210 = vadd.xlane.f32.xlu0 %v1209_v27 }
 0x43c   : > { %1336 = vrot.lane.b32.xlu1 %v3770_v52, %s3449_s18 }
 0x440   : > { %1338 = vrot.lane.b32.xlu1 %v3790_v11, %s3449_s18 }
 0x44a   : > { %1334 = vrot.lane.b32.xlu0 %v3774_v54, %s3449_s18 }
 0x44e   : > { %1322 = vrot.lane.b32.xlu0 %v3772_v53, %s3449_s18 }
 0x452   : > { %1326 = vrot.lane.b32.xlu0 %v3788_v10, %s3449_s18 }
 0x464   : > { %1219 = vadd.xlane.f32.xlu1 %v1218_v37 }
 0x468   : > { %1213 = vadd.xlane.f32.xlu1 %v1212_v39 }
 0x479   : > { %1340 = vrot.lane.b32.xlu1 %v3786_v9, %s3449_s18 }
 0x47d   : > { %1324 = vrot.lane.b32.xlu1 %v3768_v51, %s3449_s18 }
 0x481   : > { %1328 = vrot.lane.b32.xlu1 %v3784_v8, %s3449_s18 }
 0x4b0   : > { %v1205_v40 = vpop.xlane.xlu0 %1204 }
 0x4b4   : > { %v1199_v41 = vpop.xlane.xlu0 %1198  ;;  %v1208_v42 = vpop.xlane.xlu1 %1207 }
 0x4b5   : > { %3108 = vrcp.f32 %v1208_v42 }
 0x4b6   : > { %3110 = vrcp.f32 %v1199_v41 }
 0x4b7   : > { %3112 = vrcp.f32 %v1205_v40 }
 0x4b8   : > { %v1202_v43 = vpop.xlane.xlu1 %1201 }
 0x4b9   : > { %3114 = vrcp.f32 %v1202_v43 }
 0x4bc   : > { %v1337_v62 = vpop.permute.xlu1 %1336 }
 0x4bd   : > { %v1217_v44 = vpop.xlane.xlu0 %1216  ;;  %v1358_v63 = vsel %vm1058_vm0, %v1337_v62, 0 }
 0x4bf   : > { %v3109_v45 = vpop.eup %3108 }
 0x4c0   : > { %v3111_v46 = vpop.eup %3110  ;;  %v1228_v50 = vmul.f32 %v3109_v45, %v3097_v17  ;;  %v1339_v0 = vpop.permute.xlu1 %1338 }
 0x4c1   : > { %v1211_v47 = vpop.xlane.xlu0 %1210  ;;  %v3113_v48 = vpop.eup %3112  ;;  %v1222_v55 = vmul.f32 %v3111_v46, %v3095_v16  ;;  %v1361_v1 = vsel %vm1058_vm0, %v1339_v0, 0 }
 0x4c2   : > { %v1226_v57 = vmul.f32 %v3113_v48, %v3093_v12 }
 0x4c3   : > { %v3115_v49 = vpop.eup %3114 }
 0x4c4   : > { %v1224_v56 = vmul.f32 %v3115_v49, %v3099_v20  ;;  %v1238_v60 = vpack.c.bf16 %v1228_v50, %v1226_v57 }
 0x4c5   : > { %v1335_v58 = vpop.permute.xlu0 %1334 }
 0x4c6   : > { %2912 = vmatprep.subr.msk.bf16.mxu1 %vm1058_vm0, %v1335_v58  ;;  %v1237_v59 = vpack.c.bf16 %v1224_v56, %v1222_v55  ;;  %v1355_v61 = vsel %vm1058_vm0, %v1335_v58, 0 }
 0x4c8   : > { %2804 = vmatprep.mubr.msk.bf16.mxu1 %vm1148_vm1, %v1237_v59 }
 0x4c9   : > { %2805 = vmatmul.mubr.msk.bf16.vlgmr.msra.gmra.mrb[16].mxu1 %vm1148_vm1, %v1238_v60  ;;  %v1323_v20 = vpop.permute.xlu0 %1322 }
 0x4ca   : > { %2813 = vmatpush3.bf16.xpose.msra.mxu1 %v1355_v61 }
 0x4cb   : > { %2913 = vmatprep.subr.msk.bf16.mxu1 %vm1058_vm0, %v1337_v62 }
 0x4cd   : > { %v1327_v23 = vpop.permute.xlu0 %1326 }
 0x4d2   : > { %2815 = vmatpush3.bf16.xpose.msra.mxu1 %v1358_v63 }
 0x4d3   : > { %2914 = vmatprep.subr.msk.bf16.mxu1 %vm1058_vm0, %v1339_v0 }
 0x4da   : > { %2817 = vmatpush3.bf16.xpose.msra.mxu1 %v1361_v1 }
 0x4f1   : > { %v1220_v2 = vpop.xlane.xlu1 %1219 }
 0x4f2   : > { %3116 = vrcp.f32 %v1220_v2 }
 0x4f3   : > { %3118 = vrcp.f32 %v1211_v47 }
 0x4f4   : > { %3120 = vrcp.f32 %v1217_v44 }
 0x4f5   : > { %v1214_v3 = vpop.xlane.xlu1 %1213 }
 0x4f6   : > { %3122 = vrcp.f32 %v1214_v3 }
 0x4f9   : > { %v1341_v4 = vpop.permute.xlu1 %1340 }
 0x4fa   : > { %2915 = vmatprep.subr.msk.bf16.mxu1 %vm1058_vm0, %v1341_v4  ;;  %v1364_v5 = vsel %vm1058_vm0, %v1341_v4, 0 }
 0x4fb   : > { %2819 = vmatpush3.bf16.xpose.msra.mxu1 %v1364_v5 }
 0x4fc   : > { %v3117_v6 = vpop.eup %3116 }
 0x4fd   : > { %v3119_v7 = vpop.eup %3118  ;;  %v1236_v14 = vmul.f32 %v3117_v6, %v3105_v36  ;;  %v1325_v21 = vpop.permute.xlu1 %1324 }
 0x4fe   : > { %v3121_v12 = vpop.eup %3120  ;;  %v1230_v15 = vmul.f32 %v3119_v7, %v3843_v26 }
 0x4ff   : > { %v1234_v17 = vmul.f32 %v3121_v12, %v3839_v22 }
 0x500   : > { %v3123_v13 = vpop.eup %3122 }
 0x501   : > { %v1232_v16 = vmul.f32 %v3123_v13, %v3107_v38  ;;  %v1240_v19 = vpack.c.bf16 %v1236_v14, %v1234_v17  ;;  %v1329_v27 = vpop.permute.xlu1 %1328 }
 0x503   : > { %v1239_v18 = vpack.c.bf16 %v1232_v16, %v1230_v15 }
 0x505   : > { %2808 = vmatprep.mubr.msk.bf16.mxu1 %vm1148_vm1, %v1239_v18 }
 0x506   : > { %2809 = vmatmul.mubr.msk.bf16.gmra.mrb[20].mxu1 %vm1148_vm1, %v1240_v19 }
 0x507   : > { %2820 = vmatprep.mubr.msk.bf16.mxu1 %vm1058_vm0, %v1323_v20 }
 0x50e   : > { %2821 = vmatmul.mubr.msk.bf16.vlgmr.msra.gmra.mrb[24].mxu1 %vm1058_vm0, %v1325_v21 }
 0x50f   : > { %2824 = vmatprep.mubr.msk.bf16.mxu1 %vm1058_vm0, %v1327_v23 }
 0x516   : > { %2825 = vmatmul.mubr.msk.bf16.gmra.mrb[28].mxu1 %vm1058_vm0, %v1329_v27 }
 0x59c   : > { %v3883_v26 = vpop.f32.mrb[16].mxu1 }
 0x59d   : > { %v3885_v22 = vpop.f32.mrb[17].mxu1 }
 0x59e   : > { %v3887_v29 = vpop.f32.mrb[18].mxu1 }
 0x59f   : > { %v3889_v28 = vpop.f32.mrb[19].mxu1 }
 0x5d9   : > { %v3891_v30 = vpop.f32.mrb[20].mxu1 }
 0x5da   : > { %v3893_v31 = vpop.f32.mrb[21].mxu1 }
 0x5db   : > { %v3895_v32 = vpop.f32.mrb[22].mxu1 }
 0x5dc   : > { %v3897_v33 = vpop.f32.mrb[23].mxu1 }
 0x5e1   : > { %v2822_v36 = vpop.f32.mrb[24].mxu1 }
 0x5e2   : > { %v1400_v37 = vpop.f32.mrb[25].mxu1  ;;  %v1437_v38 = vsel %vm1148_vm1, %v2822_v36, -inf }
 0x5e3   : > { %1438 = vmax.xlane.f32.xlu0 %v1437_v38  ;;  %v2823_v39 = vpop.f32.mrb[26].mxu1  ;;  %v1431_v42 = vsel %vm1148_vm1, %v1400_v37, -inf }
 0x5e4   : > { %v1403_v40 = vpop.f32.mrb[27].mxu1  ;;  %v1440_v45 = vsel %vm1148_vm1, %v2823_v39, -inf }
 0x5e5   : > { %v1434_v41 = vsel %vm1148_vm1, %v1403_v40, -inf }
 0x5e6   : > { %1435 = vmax.xlane.f32.xlu1 %v1434_v41 }
 0x5e7   : > { %1432 = vmax.xlane.f32.xlu0 %v1431_v42 }
 0x5e9   : > { %v2826_v43 = vpop.f32.mrb[28].mxu1 }
 0x5ea   : > { %v1416_v44 = vpop.f32.mrb[29].mxu1  ;;  %v1449_v48 = vsel %vm1148_vm1, %v2826_v43, -inf }
 0x5eb   : > { %1441 = vmax.xlane.f32.xlu0 %v1440_v45  ;;  %v3903_v46 = vpop.f32.mrb[30].mxu1  ;;  %v1443_v49 = vsel %vm1148_vm1, %v1416_v44, -inf }
 0x5ec   : > { %v3905_v47 = vpop.f32.mrb[31].mxu1  ;;  %v1452_v50 = vsel %vm1148_vm1, %v3903_v46, -inf }
 0x5ed   : > { %v1446_v55 = vsel %vm1148_vm1, %v3905_v47, -inf }
 0x5ef   : > { %1450 = vmax.xlane.f32.xlu0 %v1449_v48 }
 0x5f3   : > { %1444 = vmax.xlane.f32.xlu0 %v1443_v49 }
 0x5f7   : > { %1529 = vrot.lane.b32.xlu1 %v3805_v24, %s3449_s18 }
 0x5fb   : > { %1531 = vrot.lane.b32.xlu1 %v3819_v35, %s3449_s18 }
 0x609   : > { %1527 = vrot.lane.b32.xlu0 %v3807_v25, %s3449_s18 }
 0x61f   : > { %1453 = vmax.xlane.f32.xlu1 %v1452_v50 }
 0x623   : > { %1447 = vmax.xlane.f32.xlu1 %v1446_v55 }
 0x634   : > { %1533 = vrot.lane.b32.xlu1 %v3816_v34, %s3449_s18 }
 0x670   : > { %v1439_v56 = vpop.xlane.xlu0 %1438 }
 0x671   : > { %v1457_v57 = vsub.f32 %v2822_v36, %v1439_v56 }
 0x673   : > { %v1467_v58 = vmul.f32 1.442695, %v1457_v57  ;;  %v1436_v59 = vpop.xlane.xlu1 %1435 }
 0x674   : > { %v1433_v60 = vpop.xlane.xlu0 %1432  ;;  %v1456_v62 = vsub.f32 %v1403_v40, %v1436_v59 }
 0x675   : > { %3124 = vpow2.f32 %v1467_v58  ;;  %v1455_v61 = vsub.f32 %v1400_v37, %v1433_v60 }
 0x676   : > { %v1465_v2 = vmul.f32 1.442695, %v1456_v62 }
 0x677   : > { %v1463_v63 = vmul.f32 1.442695, %v1455_v61  ;;  %v1530_v17 = vpop.permute.xlu1 %1529 }
 0x678   : > { %v1442_v0 = vpop.xlane.xlu0 %1441 }
 0x679   : > { %3126 = vpow2.f32 %v1463_v63  ;;  %v1458_v1 = vsub.f32 %v2823_v39, %v1442_v0 }
 0x67b   : > { %v1469_v3 = vmul.f32 1.442695, %v1458_v1  ;;  %v1532_v27 = vpop.permute.xlu1 %1531 }
 0x67c   : > { %v1451_v4 = vpop.xlane.xlu0 %1450 }
 0x67d   : > { %3128 = vpow2.f32 %v1469_v3  ;;  %v1461_v5 = vsub.f32 %v2826_v43, %v1451_v4 }
 0x67e   : > { %3130 = vpow2.f32 %v1465_v2 }
 0x67f   : > { %v3921_v6 = vpop.eup %3124  ;;  %v1475_v7 = vmul.f32 1.442695, %v1461_v5 }
 0x680   : > { %v1445_v12 = vpop.xlane.xlu0 %1444  ;;  %v1485_v13 = vsel %vm1148_vm1, %v3921_v6, 0.0 }
 0x681   : > { %3132 = vpow2.f32 %v1475_v7  ;;  %v1459_v14 = vsub.f32 %v1416_v44, %v1445_v12  ;;  %1486 = vadd.xlane.f32.xlu0 %v1485_v13 }
 0x683   : > { %v3925_v15 = vpop.eup %3126  ;;  %v1471_v16 = vmul.f32 1.442695, %v1459_v14 }
 0x684   : > { %v1528_v18 = vpop.permute.xlu0 %1527  ;;  %v1479_v19 = vsel %vm1148_vm1, %v3925_v15, 0.0 }
 0x685   : > { %3134 = vpow2.f32 %v1471_v16  ;;  %1480 = vadd.xlane.f32.xlu0 %v1479_v19  ;;  %2828 = vmatprep.subr.bf16.mxu0 %v1528_v18 }
 0x686   : > { %2829 = vmatpush3.bf16.msra.mxu0 %v1528_v18 }
 0x687   : > { %v3129_v20 = vpop.eup %3128  ;;  %2830 = vmatprep.subr.bf16.mxu0 %v1530_v17 }
 0x688   : > { %v1488_v21 = vsel %vm1148_vm1, %v3129_v20, 0.0  ;;  %v3131_v23 = vpop.eup %3130 }
 0x689   : > { %1489 = vadd.xlane.f32.xlu1 %v1488_v21  ;;  %v1482_v38 = vsel %vm1148_vm1, %v3131_v23, 0.0 }
 0x68a   : > { %2831 = vmatpush3.bf16.msra.mxu0 %v1530_v17 }
 0x68b   : > { %v3930_v36 = vpop.eup %3132  ;;  %2832 = vmatprep.subr.bf16.mxu0 %v1532_v27 }
 0x68c   : > { %v1497_v37 = vsel %vm1148_vm1, %v3930_v36, 0.0 }
 0x68d   : > { %1498 = vadd.xlane.f32.xlu0 %v1497_v37  ;;  %1483 = vadd.xlane.f32.xlu1 %v1482_v38 }
 0x68e   : > { %2833 = vmatpush3.bf16.msra.mxu0 %v1532_v27 }
 0x68f   : > { %v3935_v39 = vpop.eup %3134 }
 0x690   : > { %v1491_v40 = vsel %vm1148_vm1, %v3935_v39, 0.0 }
 0x691   : > { %1492 = vadd.xlane.f32.xlu0 %v1491_v40 }
 0x69e   : > { %1626 = vrot.lane.b32.xlu1 %v3770_v52, %s3450_s16 }
 0x6a2   : > { %1628 = vrot.lane.b32.xlu1 %v3790_v11, %s3450_s16 }
 0x6ac   : > { %v1454_v41 = vpop.xlane.xlu1 %1453 }
 0x6ad   : > { %v1462_v42 = vsub.f32 %v3903_v46, %v1454_v41 }
 0x6af   : > { %v1477_v43 = vmul.f32 1.442695, %v1462_v42 }
 0x6b0   : > { %v1448_v44 = vpop.xlane.xlu1 %1447 }
 0x6b1   : > { %3136 = vpow2.f32 %v1477_v43  ;;  %v1460_v45 = vsub.f32 %v3905_v47, %v1448_v44 }
 0x6b3   : > { %v1473_v48 = vmul.f32 1.442695, %v1460_v45 }
 0x6b4   : > { %v1534_v49 = vpop.permute.xlu1 %1533 }
 0x6b5   : > { %2834 = vmatprep.subr.bf16.mxu0 %v1534_v49  ;;  %3138 = vpow2.f32 %v1473_v48 }
 0x6b6   : > { %2835 = vmatpush3.bf16.msra.mxu0 %v1534_v49 }
 0x6bb   : > { %v3137_v50 = vpop.eup %3136 }
 0x6bc   : > { %v1500_v55 = vsel %vm1148_vm1, %v3137_v50, 0.0 }
 0x6bd   : > { %1501 = vadd.xlane.f32.xlu0 %v1500_v55 }
 0x6bf   : > { %v3139_v56 = vpop.eup %3138 }
 0x6c0   : > { %v1494_v57 = vsel %vm1148_vm1, %v3139_v56, 0.0 }
 0x6c6   : > { %1495 = vadd.xlane.f32.xlu1 %v1494_v57 }
 0x6d3   : > { %1624 = vrot.lane.b32.xlu0 %v3774_v54, %s3450_s16 }
 0x6d7   : > { %1616 = vrot.lane.b32.xlu0 %v3772_v53, %s3450_s16  ;;  %1630 = vrot.lane.b32.xlu1 %v3786_v9, %s3450_s16 }
 0x6db   : > { %1620 = vrot.lane.b32.xlu0 %v3788_v10, %s3450_s16  ;;  %1618 = vrot.lane.b32.xlu1 %v3768_v51, %s3450_s16 }
 0x6df   : > { %1622 = vrot.lane.b32.xlu1 %v3784_v8, %s3450_s16 }
 0x70e   : > { %v1487_v46 = vpop.xlane.xlu0 %1486 }
 0x712   : > { %v1481_v58 = vpop.xlane.xlu0 %1480 }
 0x716   : > { %v1490_v47 = vpop.xlane.xlu1 %1489 }
 0x717   : > { %3140 = vrcp.f32 %v1490_v47 }
 0x718   : > { %3142 = vrcp.f32 %v1481_v58 }
 0x719   : > { %3144 = vrcp.f32 %v1487_v46 }
 0x71a   : > { %v1484_v59 = vpop.xlane.xlu1 %1483  ;;  %v1499_v7 = vpop.xlane.xlu0 %1498 }
 0x71b   : > { %3146 = vrcp.f32 %v1484_v59 }
 0x71e   : > { %v1493_v12 = vpop.xlane.xlu0 %1492  ;;  %v1627_v13 = vpop.permute.xlu1 %1626 }
 0x721   : > { %v3141_v60 = vpop.eup %3140 }
 0x722   : > { %v3143_v61 = vpop.eup %3142  ;;  %v1510_v0 = vmul.f32 %v3141_v60, %v3129_v20  ;;  %v1629_v17 = vpop.permute.xlu1 %1628 }
 0x723   : > { %v3145_v62 = vpop.eup %3144  ;;  %v1504_v1 = vmul.f32 %v3143_v61, %v3925_v15  ;;  %v1648_v15 = vsel %vm1058_vm0, %v1627_v13, 0  ;;  %v1651_v37 = vsel %vm1058_vm0, %v1629_v17, 0 }
 0x724   : > { %v1508_v3 = vmul.f32 %v3145_v62, %v3921_v6 }
 0x725   : > { %v3147_v63 = vpop.eup %3146 }
 0x726   : > { %v1506_v2 = vmul.f32 %v3147_v63, %v3131_v23  ;;  %v1520_v5 = vpack.c.bf16 %v1510_v0, %v1508_v3 }
 0x728   : > { %v1519_v4 = vpack.c.bf16 %v1506_v2, %v1504_v1 }
 0x72a   : > { %2836 = vmatprep.mubr.msk.bf16.mxu0 %vm1148_vm1, %v1519_v4 }
 0x72b   : > { %2837 = vmatmul.mubr.msk.bf16.vlgmr.msra.gmra.mrb[24].mxu0 %vm1148_vm1, %v1520_v5 }
 0x74a   : > { %v1502_v14 = vpop.xlane.xlu0 %1501 }
 0x74b   : > { %3148 = vrcp.f32 %v1502_v14 }
 0x74c   : > { %3150 = vrcp.f32 %v1493_v12 }
 0x74d   : > { %3152 = vrcp.f32 %v1499_v7 }
 0x74e   : > { %v1625_v16 = vpop.permute.xlu0 %1624 }
 0x74f   : > { %v1645_v18 = vsel %vm1058_vm0, %v1625_v16, 0  ;;  %2916 = vmatprep.subr.msk.bf16.mxu0 %vm1058_vm0, %v1625_v16 }
 0x750   : > { %2845 = vmatpush3.bf16.xpose.msra.mxu0 %v1645_v18 }
 0x751   : > { %2917 = vmatprep.subr.msk.bf16.mxu0 %vm1058_vm0, %v1627_v13 }
 0x752   : > { %v1617_v45 = vpop.permute.xlu0 %1616 }
 0x753   : > { %v1496_v6 = vpop.xlane.xlu1 %1495 }
 0x754   : > { %3154 = vrcp.f32 %v1496_v6 }
 0x755   : > { %v3149_v19 = vpop.eup %3148 }
 0x756   : > { %v3151_v20 = vpop.eup %3150  ;;  %v1518_v27 = vmul.f32 %v3149_v19, %v3137_v50  ;;  %v1621_v49 = vpop.permute.xlu0 %1620 }
 0x757   : > { %v3153_v21 = vpop.eup %3152  ;;  %v1512_v38 = vmul.f32 %v3151_v20, %v3935_v39  ;;  %v1631_v41 = vpop.permute.xlu1 %1630 }
 0x758   : > { %2847 = vmatpush3.bf16.xpose.msra.mxu0 %v1648_v15  ;;  %v1516_v42 = vmul.f32 %v3153_v21, %v3930_v36  ;;  %v1654_v48 = vsel %vm1058_vm0, %v1631_v41, 0 }
 0x759   : > { %2918 = vmatprep.subr.msk.bf16.mxu0 %vm1058_vm0, %v1629_v17 }
 0x75a   : > { %v1522_v44 = vpack.c.bf16 %v1518_v27, %v1516_v42 }
 0x75b   : > { %v1619_v39 = vpop.permute.xlu1 %1618 }
 0x75e   : > { %v3155_v23 = vpop.eup %3154 }
 0x75f   : > { %v1514_v40 = vmul.f32 %v3155_v23, %v3139_v56  ;;  %v1623_v36 = vpop.permute.xlu1 %1622 }
 0x760   : > { %2849 = vmatpush3.bf16.xpose.msra.mxu0 %v1651_v37 }
 0x761   : > { %2919 = vmatprep.subr.msk.bf16.mxu0 %vm1058_vm0, %v1631_v41  ;;  %v1521_v43 = vpack.c.bf16 %v1514_v40, %v1512_v38 }
 0x763   : > { %2840 = vmatprep.mubr.msk.bf16.mxu0 %vm1148_vm1, %v1521_v43 }
 0x764   : > { %2841 = vmatmul.mubr.msk.bf16.gmra.mrb[28].mxu0 %vm1148_vm1, %v1522_v44 }
 0x765   : > { %2852 = vmatprep.mubr.msk.bf16.mxu0 %vm1058_vm0, %v1617_v45 }
 0x768   : > { %2851 = vmatpush3.bf16.xpose.msra.mxu0 %v1654_v48 }
 0x76f   : > { %2853 = vmatmul.mubr.msk.bf16.vlgmr.msra.gmra.mrb[32].mxu0 %vm1058_vm0, %v1619_v39 }
 0x770   : > { %2856 = vmatprep.mubr.msk.bf16.mxu0 %vm1058_vm0, %v1621_v49 }
 0x777   : > { %2857 = vmatmul.mubr.msk.bf16.gmra.mrb[36].mxu0 %vm1058_vm0, %v1623_v36 }
 0x7fe   : > { %v3979_v50 = vpop.f32.mrb[24].mxu0 }
 0x7ff   : > { %v3981_v55 = vpop.f32.mrb[25].mxu0 }
 0x800   : > { %v3983_v56 = vpop.f32.mrb[26].mxu0 }
 0x801   : > { %v3985_v57 = vpop.f32.mrb[27].mxu0 }
 0x837   : > { %v3987_v46 = vpop.f32.mrb[28].mxu0 }
 0x838   : > { %v3989_v47 = vpop.f32.mrb[29].mxu0 }
 0x839   : > { %v3991_v58 = vpop.f32.mrb[30].mxu0 }
 0x83a   : > { %v3993_v59 = vpop.f32.mrb[31].mxu0 }
 0x842   : > { %v2854_v60 = vpop.f32.mrb[32].mxu0 }
 0x843   : > { %v1690_v61 = vpop.f32.mrb[33].mxu0  ;;  %v1727_v62 = vsel %vm1148_vm1, %v2854_v60, -inf }
 0x844   : > { %1728 = vmax.xlane.f32.xlu0 %v1727_v62  ;;  %v2855_v63 = vpop.f32.mrb[34].mxu0  ;;  %v1721_v2 = vsel %vm1148_vm1, %v1690_v61, -inf }
 0x845   : > { %v1693_v0 = vpop.f32.mrb[35].mxu0  ;;  %v1730_v5 = vsel %vm1148_vm1, %v2855_v63, -inf }
 0x846   : > { %v1724_v1 = vsel %vm1148_vm1, %v1693_v0, -inf }
 0x847   : > { %1725 = vmax.xlane.f32.xlu1 %v1724_v1 }
 0x848   : > { %1722 = vmax.xlane.f32.xlu0 %v1721_v2 }
 0x84a   : > { %v2858_v3 = vpop.f32.mrb[36].mxu0 }
 0x84b   : > { %v1706_v4 = vpop.f32.mrb[37].mxu0  ;;  %v1739_v13 = vsel %vm1148_vm1, %v2858_v3, -inf }
 0x84c   : > { %1731 = vmax.xlane.f32.xlu0 %v1730_v5  ;;  %v3999_v7 = vpop.f32.mrb[38].mxu0  ;;  %v1733_v14 = vsel %vm1148_vm1, %v1706_v4, -inf }
 0x84d   : > { %v4001_v12 = vpop.f32.mrb[39].mxu0  ;;  %v1742_v16 = vsel %vm1148_vm1, %v3999_v7, -inf }
 0x84e   : > { %v1736_v17 = vsel %vm1148_vm1, %v4001_v12, -inf }
 0x850   : > { %1740 = vmax.xlane.f32.xlu0 %v1739_v13 }
 0x854   : > { %1734 = vmax.xlane.f32.xlu0 %v1733_v14 }
 0x858   : > { %1815 = vrot.lane.b32.xlu1 %v3805_v24, %s3450_s16 }
 0x85c   : > { %1817 = vrot.lane.b32.xlu1 %v3819_v35, %s3450_s16 }
 0x86a   : > { %1813 = vrot.lane.b32.xlu0 %v3807_v25, %s3450_s16 }
 0x880   : > { %1743 = vmax.xlane.f32.xlu1 %v1742_v16 }
 0x884   : > { %1737 = vmax.xlane.f32.xlu1 %v1736_v17 }
 0x895   : > { %1819 = vrot.lane.b32.xlu1 %v3816_v34, %s3450_s16  ;;  %s3455_s16 = smov [#allocation11]  }
 0x8d1   : > { %v1729_v18 = vpop.xlane.xlu0 %1728 }
 0x8d2   : > { %v1747_v6 = vsub.f32 %v2854_v60, %v1729_v18 }
 0x8d4   : > { %v1757_v15 = vmul.f32 1.442695, %v1747_v6  ;;  %v1726_v19 = vpop.xlane.xlu1 %1725 }
 0x8d5   : > { %v1723_v20 = vpop.xlane.xlu0 %1722  ;;  %v1746_v23 = vsub.f32 %v1693_v0, %v1726_v19 }
 0x8d6   : > { %3156 = vpow2.f32 %v1757_v15  ;;  %v1745_v21 = vsub.f32 %v1690_v61, %v1723_v20 }
 0x8d7   : > { %v1755_v40 = vmul.f32 1.442695, %v1746_v23 }
 0x8d8   : > { %v1753_v27 = vmul.f32 1.442695, %v1745_v21  ;;  %v1816_v61 = vpop.permute.xlu1 %1815 }
 0x8d9   : > { %v1732_v37 = vpop.xlane.xlu0 %1731 }
 0x8da   : > { %3158 = vpow2.f32 %v1753_v27  ;;  %v1748_v38 = vsub.f32 %v2855_v63, %v1732_v37 }
 0x8dc   : > { %v1759_v41 = vmul.f32 1.442695, %v1748_v38 }
 0x8dd   : > { %v1741_v42 = vpop.xlane.xlu0 %1740 }
 0x8de   : > { %3160 = vpow2.f32 %v1759_v41  ;;  %v1751_v43 = vsub.f32 %v2858_v3, %v1741_v42  ;;  %v1818_v3 = vpop.permute.xlu1 %1817 }
 0x8df   : > { %3162 = vpow2.f32 %v1755_v40 }
 0x8e0   : > { %v4017_v44 = vpop.eup %3156  ;;  %v1765_v45 = vmul.f32 1.442695, %v1751_v43 }
 0x8e1   : > { %v1735_v48 = vpop.xlane.xlu0 %1734  ;;  %v1775_v39 = vsel %vm1148_vm1, %v4017_v44, 0.0 }
 0x8e2   : > { %3164 = vpow2.f32 %v1765_v45  ;;  %v1749_v49 = vsub.f32 %v1706_v4, %v1735_v48  ;;  %1776 = vadd.xlane.f32.xlu0 %v1775_v39 }
 0x8e4   : > { %v4021_v36 = vpop.eup %3158  ;;  %v1761_v60 = vmul.f32 1.442695, %v1749_v49 }
 0x8e5   : > { %v1814_v62 = vpop.permute.xlu0 %1813  ;;  %v1769_v63 = vsel %vm1148_vm1, %v4021_v36, 0.0 }
 0x8e6   : > { %3166 = vpow2.f32 %v1761_v60  ;;  %1770 = vadd.xlane.f32.xlu0 %v1769_v63  ;;  %2860 = vmatprep.subr.bf16.mxu1 %v1814_v62 }
 0x8e7   : > { %2861 = vmatpush3.bf16.msra.mxu1 %v1814_v62 }
 0x8e8   : > { %v3161_v0 = vpop.eup %3160  ;;  %2862 = vmatprep.subr.bf16.mxu1 %v1816_v61 }
 0x8e9   : > { %v1778_v1 = vsel %vm1148_vm1, %v3161_v0, 0.0  ;;  %v3163_v2 = vpop.eup %3162 }
 0x8ea   : > { %1779 = vadd.xlane.f32.xlu1 %v1778_v1  ;;  %v1772_v13 = vsel %vm1148_vm1, %v3163_v2, 0.0 }
 0x8eb   : > { %2863 = vmatpush3.bf16.msra.mxu1 %v1816_v61 }
 0x8ec   : > { %v4026_v4 = vpop.eup %3164  ;;  %2864 = vmatprep.subr.bf16.mxu1 %v1818_v3 }
 0x8ed   : > { %v1787_v5 = vsel %vm1148_vm1, %v4026_v4, 0.0 }
 0x8ee   : > { %1788 = vadd.xlane.f32.xlu0 %v1787_v5  ;;  %1773 = vadd.xlane.f32.xlu1 %v1772_v13 }
 0x8ef   : > { %2865 = vmatpush3.bf16.msra.mxu1 %v1818_v3 }
 0x8f0   : > { %v4031_v14 = vpop.eup %3166 }
 0x8f1   : > { %v1781_v16 = vsel %vm1148_vm1, %v4031_v14, 0.0 }
 0x8f2   : > { %1782 = vadd.xlane.f32.xlu0 %v1781_v16 }
 0x8ff   : > { %1912 = vrot.lane.b32.xlu1 %v3770_v52, %s3451_s23 }
 0x903   : > { %1914 = vrot.lane.b32.xlu1 %v3790_v11, %s3451_s23 }
 0x90d   : > { %v1744_v17 = vpop.xlane.xlu1 %1743 }
 0x90e   : > { %v1752_v18 = vsub.f32 %v3999_v7, %v1744_v17 }
 0x910   : > { %v1767_v6 = vmul.f32 1.442695, %v1752_v18 }
 0x911   : > { %v1738_v15 = vpop.xlane.xlu1 %1737 }
 0x912   : > { %3168 = vpow2.f32 %v1767_v6  ;;  %v1750_v19 = vsub.f32 %v4001_v12, %v1738_v15 }
 0x914   : > { %v1763_v20 = vmul.f32 1.442695, %v1750_v19 }
 0x915   : > { %v1820_v21 = vpop.permute.xlu1 %1819 }
 0x916   : > { %2866 = vmatprep.subr.bf16.mxu1 %v1820_v21  ;;  %3170 = vpow2.f32 %v1763_v20 }
 0x917   : > { %2867 = vmatpush3.bf16.msra.mxu1 %v1820_v21 }
 0x91c   : > { %v3169_v23 = vpop.eup %3168 }
 0x91d   : > { %v1790_v27 = vsel %vm1148_vm1, %v3169_v23, 0.0 }
 0x91e   : > { %1791 = vadd.xlane.f32.xlu0 %v1790_v27 }
 0x920   : > { %v3171_v52 = vpop.eup %3170 }
 0x921   : > { %v1784_v11 = vsel %vm1148_vm1, %v3171_v52, 0.0 }
 0x927   : > { %1785 = vadd.xlane.f32.xlu1 %v1784_v11 }
 0x934   : > { %1910 = vrot.lane.b32.xlu0 %v3774_v54, %s3451_s23 }
 0x938   : > { %1902 = vrot.lane.b32.xlu0 %v3772_v53, %s3451_s23  ;;  %1916 = vrot.lane.b32.xlu1 %v3786_v9, %s3451_s23 }
 0x93c   : > { %1906 = vrot.lane.b32.xlu0 %v3788_v10, %s3451_s23  ;;  %1904 = vrot.lane.b32.xlu1 %v3768_v51, %s3451_s23 }
 0x940   : > { %1908 = vrot.lane.b32.xlu1 %v3784_v8, %s3451_s23 }
 0x96f   : > { %v1777_v7 = vpop.xlane.xlu0 %1776 }
 0x973   : > { %v1771_v37 = vpop.xlane.xlu0 %1770 }
 0x977   : > { %v1780_v12 = vpop.xlane.xlu1 %1779 }
 0x978   : > { %3172 = vrcp.f32 %v1780_v12 }
 0x979   : > { %3174 = vrcp.f32 %v1771_v37 }
 0x97a   : > { %3176 = vrcp.f32 %v1777_v7 }
 0x97b   : > { %v1774_v54 = vpop.xlane.xlu1 %1773  ;;  %v1789_v45 = vpop.xlane.xlu0 %1788 }
 0x97c   : > { %3178 = vrcp.f32 %v1774_v54 }
 0x97f   : > { %v1783_v48 = vpop.xlane.xlu0 %1782  ;;  %v1913_v39 = vpop.permute.xlu1 %1912 }
 0x982   : > { %v3173_v53 = vpop.eup %3172 }
 0x983   : > { %v3175_v38 = vpop.eup %3174  ;;  %v1800_v41 = vmul.f32 %v3173_v53, %v3161_v0  ;;  %v1915_v61 = vpop.permute.xlu1 %1914 }
 0x984   : > { %v3177_v9 = vpop.eup %3176  ;;  %v1794_v10 = vmul.f32 %v3175_v38, %v4021_v36  ;;  %v1934_v36 = vsel %vm1058_vm0, %v1913_v39, 0  ;;  %v1937_v5 = vsel %vm1058_vm0, %v1915_v61, 0 }
 0x985   : > { %v1798_v51 = vmul.f32 %v3177_v9, %v4017_v44 }
 0x986   : > { %v3179_v40 = vpop.eup %3178 }
 0x987   : > { %v1796_v42 = vmul.f32 %v3179_v40, %v3163_v2  ;;  %v1810_v8 = vpack.c.bf16 %v1800_v41, %v1798_v51 }
 0x989   : > { %v1809_v43 = vpack.c.bf16 %v1796_v42, %v1794_v10 }
 0x98b   : > { %2868 = vmatprep.mubr.msk.bf16.mxu1 %vm1148_vm1, %v1809_v43 }
 0x98c   : > { %2869 = vmatmul.mubr.msk.bf16.vlgmr.msra.gmra.mrb[32].mxu1 %vm1148_vm1, %v1810_v8 }
 0x9ab   : > { %v1792_v49 = vpop.xlane.xlu0 %1791 }
 0x9ac   : > { %3180 = vrcp.f32 %v1792_v49 }
 0x9ad   : > { %3182 = vrcp.f32 %v1783_v48 }
 0x9ae   : > { %3184 = vrcp.f32 %v1789_v45 }
 0x9af   : > { %v1911_v60 = vpop.permute.xlu0 %1910 }
 0x9b0   : > { %v1931_v62 = vsel %vm1058_vm0, %v1911_v60, 0  ;;  %2920 = vmatprep.subr.msk.bf16.mxu1 %vm1058_vm0, %v1911_v60 }
 0x9b1   : > { %2877 = vmatpush3.bf16.xpose.msra.mxu1 %v1931_v62 }
 0x9b2   : > { %2921 = vmatprep.subr.msk.bf16.mxu1 %vm1058_vm0, %v1913_v39 }
 0x9b3   : > { %v1903_v19 = vpop.permute.xlu0 %1902 }
 0x9b4   : > { %v1786_v44 = vpop.xlane.xlu1 %1785 }
 0x9b5   : > { %3186 = vrcp.f32 %v1786_v44 }
 0x9b6   : > { %v3181_v63 = vpop.eup %3180 }
 0x9b7   : > { %v3183_v0 = vpop.eup %3182  ;;  %v1808_v3 = vmul.f32 %v3181_v63, %v3169_v23  ;;  %v1907_v21 = vpop.permute.xlu0 %1906 }
 0x9b8   : > { %v3185_v1 = vpop.eup %3184  ;;  %v1802_v13 = vmul.f32 %v3183_v0, %v4031_v14  ;;  %v1917_v17 = vpop.permute.xlu1 %1916 }
 0x9b9   : > { %2879 = vmatpush3.bf16.xpose.msra.mxu1 %v1934_v36  ;;  %v1806_v18 = vmul.f32 %v3185_v1, %v4026_v4  ;;  %v1940_v20 = vsel %vm1058_vm0, %v1917_v17, 0 }
 0x9ba   : > { %2922 = vmatprep.subr.msk.bf16.mxu1 %vm1058_vm0, %v1915_v61 }
 0x9bb   : > { %v1812_v15 = vpack.c.bf16 %v1808_v3, %v1806_v18 }
 0x9bc   : > { %v1905_v14 = vpop.permute.xlu1 %1904 }
 0x9bf   : > { %v3187_v2 = vpop.eup %3186 }
 0x9c0   : > { %v1804_v16 = vmul.f32 %v3187_v2, %v3171_v52  ;;  %v1909_v4 = vpop.permute.xlu1 %1908 }
 0x9c1   : > { %2881 = vmatpush3.bf16.xpose.msra.mxu1 %v1937_v5 }
 0x9c2   : > { %2923 = vmatprep.subr.msk.bf16.mxu1 %vm1058_vm0, %v1917_v17  ;;  %v1811_v6 = vpack.c.bf16 %v1804_v16, %v1802_v13 }
 0x9c4   : > { %2872 = vmatprep.mubr.msk.bf16.mxu1 %vm1148_vm1, %v1811_v6 }
 0x9c5   : > { %2873 = vmatmul.mubr.msk.bf16.gmra.mrb[36].mxu1 %vm1148_vm1, %v1812_v15 }
 0x9c6   : > { %2884 = vmatprep.mubr.msk.bf16.mxu1 %vm1058_vm0, %v1903_v19 }
 0x9c9   : > { %2883 = vmatpush3.bf16.xpose.msra.mxu1 %v1940_v20 }
 0x9d0   : > { %2885 = vmatmul.mubr.msk.bf16.vlgmr.msra.gmra.mrb[40].mxu1 %vm1058_vm0, %v1905_v14 }
 0x9d1   : > { %2888 = vmatprep.mubr.msk.bf16.mxu1 %vm1058_vm0, %v1907_v21 }
 0x9d8   : > { %2889 = vmatmul.mubr.msk.bf16.gmra.mrb[44].mxu1 %vm1058_vm0, %v1909_v4 }
 0xa5f   : > { %v4075_v23 = vpop.f32.mrb[32].mxu1 }
 0xa60   : > { %v4077_v27 = vpop.f32.mrb[33].mxu1 }
 0xa61   : > { %v4079_v52 = vpop.f32.mrb[34].mxu1 }
 0xa62   : > { %v4081_v11 = vpop.f32.mrb[35].mxu1 }
 0xa98   : > { %v4083_v7 = vpop.f32.mrb[36].mxu1 }
 0xa99   : > { %v4085_v12 = vpop.f32.mrb[37].mxu1 }
 0xa9a   : > { %v4087_v37 = vpop.f32.mrb[38].mxu1 }
 0xa9b   : > { %v4089_v54 = vpop.f32.mrb[39].mxu1 }
 0xaa3   : > { %v2886_v53 = vpop.f32.mrb[40].mxu1 }
 0xaa4   : > { %v1976_v38 = vpop.f32.mrb[41].mxu1  ;;  %v2013_v42 = vsel %vm1148_vm1, %v2886_v53, -inf }
 0xaa5   : > { %v2887_v9 = vpop.f32.mrb[42].mxu1  ;;  %v2007_v40 = vsel %vm1148_vm1, %v1976_v38, -inf }
 0xaa6   : > { %2008 = vmax.xlane.f32.xlu0 %v2007_v40  ;;  %v1979_v41 = vpop.f32.mrb[43].mxu1  ;;  %v2016_v45 = vsel %vm1148_vm1, %v2887_v9, -inf }
 0xaa7   : > { %v2010_v10 = vsel %vm1148_vm1, %v1979_v41, -inf }
 0xaa8   : > { %2011 = vmax.xlane.f32.xlu1 %v2010_v10 }
 0xaaa   : > { %2014 = vmax.xlane.f32.xlu0 %v2013_v42 }
 0xaab   : > { %v2890_v51 = vpop.f32.mrb[44].mxu1 }
 0xaac   : > { %v1992_v43 = vpop.f32.mrb[45].mxu1  ;;  %v2025_v61 = vsel %vm1148_vm1, %v2890_v51, -inf }
 0xaad   : > { %v4094_v8 = vpop.f32.mrb[46].mxu1  ;;  %v2019_v49 = vsel %vm1148_vm1, %v1992_v43, -inf }
 0xaae   : > { %2017 = vmax.xlane.f32.xlu0 %v2016_v45  ;;  %v4097_v48 = vpop.f32.mrb[47].mxu1  ;;  %v2028_v60 = vsel %vm1148_vm1, %v4094_v8, -inf }
 0xaaf   : > { %v2022_v39 = vsel %vm1148_vm1, %v4097_v48, -inf }
 0xab0   : > { %2023 = vmax.xlane.f32.xlu1 %v2022_v39 }
 0xab2   : > { %2020 = vmax.xlane.f32.xlu0 %v2019_v49 }
 0xab4   : > { %2029 = vmax.xlane.f32.xlu1 %v2028_v60 }
 0xab6   : > { %2026 = vmax.xlane.f32.xlu0 %v2025_v61 }
 0xb33   : > { %v2009_v62 = vpop.xlane.xlu0 %2008 }
 0xb34   : > { %v2031_v44 = vsub.f32 %v1976_v38, %v2009_v62 }
 0xb35   : > { %v2012_v36 = vpop.xlane.xlu1 %2011 }
 0xb36   : > { %v2039_v1 = vmul.f32 1.442695, %v2031_v44  ;;  %v2032_v2 = vsub.f32 %v1979_v41, %v2012_v36 }
 0xb37   : > { %v2015_v63 = vpop.xlane.xlu0 %2014 }
 0xb38   : > { %v2033_v0 = vsub.f32 %v2886_v53, %v2015_v63  ;;  %v2041_v16 = vmul.f32 1.442695, %v2032_v2 }
 0xb3a   : > { %v2043_v3 = vmul.f32 1.442695, %v2033_v0 }
 0xb3b   : > { %v2018_v5 = vpop.xlane.xlu0 %2017 }
 0xb3c   : > { %3188 = vpow2.f32 %v2043_v3  ;;  %v2034_v13 = vsub.f32 %v2887_v9, %v2018_v5 }
 0xb3d   : > { %3190 = vpow2.f32 %v2039_v1  ;;  %v2024_v39 = vpop.xlane.xlu1 %2023 }
 0xb3e   : > { %v2045_v17 = vmul.f32 1.442695, %v2034_v13  ;;  %v2036_v61 = vsub.f32 %v4097_v48, %v2024_v39 }
 0xb3f   : > { %v2021_v18 = vpop.xlane.xlu0 %2020 }
 0xb40   : > { %3192 = vpow2.f32 %v2045_v17  ;;  %v2035_v6 = vsub.f32 %v1992_v43, %v2021_v18 }
 0xb41   : > { %3194 = vpow2.f32 %v2041_v16  ;;  %v2030_v49 = vpop.xlane.xlu1 %2029 }
 0xb42   : > { %v2047_v14 = vmul.f32 1.442695, %v2035_v6  ;;  %v2038_v60 = vsub.f32 %v4094_v8, %v2030_v49 }
 0xb43   : > { %v2027_v15 = vpop.xlane.xlu0 %2026 }
 0xb44   : > { %v2037_v19 = vsub.f32 %v2890_v51, %v2027_v15  ;;  %v2053_v62 = vmul.f32 1.442695, %v2038_v60 }
 0xb46   : > { %v4105_v20 = vpop.eup %3188  ;;  %v2051_v21 = vmul.f32 1.442695, %v2037_v19 }
 0xb47   : > { %v2061_v4 = vsel %vm1148_vm1, %v4105_v20, 0.0  ;;  %v4109_v53 = vpop.eup %3190 }
 0xb48   : > { %3196 = vpow2.f32 %v2051_v21  ;;  %2062 = vadd.xlane.f32.xlu0 %v2061_v4  ;;  %v2055_v9 = vsel %vm1148_vm1, %v4109_v53, 0.0 }
 0xb49   : > { %3198 = vpow2.f32 %v2047_v14 }
 0xb4a   : > { %v4111_v38 = vpop.eup %3192  ;;  %3200 = vpow2.f32 %v2053_v62 }
 0xb4b   : > { %v2064_v40 = vsel %vm1148_vm1, %v4111_v38, 0.0  ;;  %v3195_v41 = vpop.eup %3194 }
 0xb4c   : > { %2056 = vadd.xlane.f32.xlu0 %v2055_v9  ;;  %2065 = vadd.xlane.f32.xlu1 %v2064_v40  ;;  %v2058_v10 = vsel %vm1148_vm1, %v3195_v41, 0.0 }
 0xb50   : > { %2059 = vadd.xlane.f32.xlu1 %v2058_v10 }
 0xb52   : > { %v4118_v42 = vpop.eup %3196 }
 0xb53   : > { %v2073_v51 = vsel %vm1148_vm1, %v4118_v42, 0.0  ;;  %v4122_v43 = vpop.eup %3198 }
 0xb54   : > { %2074 = vadd.xlane.f32.xlu0 %v2073_v51  ;;  %v2067_v45 = vsel %vm1148_vm1, %v4122_v43, 0.0 }
 0xb58   : > { %2068 = vadd.xlane.f32.xlu0 %v2067_v45 }
 0xb61   : > { %2101 = vrot.lane.b32.xlu1 %v3805_v24, %s3451_s23  ;;  %v2049_v24 = vmul.f32 1.442695, %v2036_v61 }
 0xb63   : > { %3202 = vpow2.f32 %v2049_v24 }
 0xb65   : > { %2103 = vrot.lane.b32.xlu1 %v3819_v35, %s3451_s23 }
 0xb6e   : > { %2099 = vrot.lane.b32.xlu0 %v3807_v25, %s3451_s23  ;;  %v3201_v25 = vpop.eup %3200 }
 0xb6f   : > { %v2076_v35 = vsel %vm1148_vm1, %v3201_v25, 0.0 }
 0xb72   : > { %2196 = vrot.lane.b32.xlu0 %v3981_v55, %s3452_s21 }
 0xb76   : > { %2200 = vrot.lane.b32.xlu0 %v3979_v50, %s3452_s21  ;;  %v3203_v50 = vpop.eup %3202 }
 0xb77   : > { %v2070_v55 = vsel %vm1148_vm1, %v3203_v50, 0.0 }
 0xb7a   : > { %2204 = vrot.lane.b32.xlu0 %v3989_v47, %s3452_s21 }
 0xb7e   : > { %2208 = vrot.lane.b32.xlu0 %v3987_v46, %s3452_s21 }
 0xb82   : > { %2228 = vrot.lane.b32.xlu0 %v4077_v27, %s3453_s24 }
 0xb86   : > { %2232 = vrot.lane.b32.xlu0 %v4075_v23, %s3453_s24 }
 0xb89   : > { %2077 = vadd.xlane.f32.xlu1 %v2076_v35 }
 0xb8a   : > { %2236 = vrot.lane.b32.xlu0 %v4085_v12, %s3453_s24 }
 0xb8d   : > { %2071 = vadd.xlane.f32.xlu1 %v2070_v55 }
 0xb8e   : > { %2240 = vrot.lane.b32.xlu0 %v4083_v7, %s3453_s24 }
 0xb9e   : > { %2105 = vrot.lane.b32.xlu1 %v3816_v34, %s3451_s23  ;;  %s3370_s23 = sshll.u32 %s3455_s16, 4  ;;  %s3371_s23 = int_to_ptr.vmem [resolvable:$false] %s3370_s23 }
 0xba2   : > { %2198 = vrot.lane.b32.xlu1 %v3985_v57, %s3452_s21 }
 0xba6   : > { %2202 = vrot.lane.b32.xlu1 %v3983_v56, %s3452_s21 }
 0xbaa   : > { %2206 = vrot.lane.b32.xlu1 %v3993_v59, %s3452_s21 }
 0xbae   : > { %2210 = vrot.lane.b32.xlu1 %v3991_v58, %s3452_s21  ;;  %s3372_s21 = scalar_lea.vmem %s3371_s23, 2048 }
 0xbb2   : > { %2230 = vrot.lane.b32.xlu1 %v4081_v11, %s3453_s24 }
 0xbb6   : > { %2234 = vrot.lane.b32.xlu1 %v4079_v52, %s3453_s24 }
 0xbba   : > { %2238 = vrot.lane.b32.xlu1 %v4089_v54, %s3453_s24 }
 0xbbe   : > { %2242 = vrot.lane.b32.xlu1 %v4087_v37, %s3453_s24 }
 0xbd5   : > { %v2063_v34 = vpop.xlane.xlu0 %2062 }
 0xbd9   : > { %v2057_v57 = vpop.xlane.xlu0 %2056  ;;  %v2066_v46 = vpop.xlane.xlu1 %2065 }
 0xbda   : > { %3204 = vrcp.f32 %v2057_v57  ;;  %v3220_v57 = vld [vmem:[%s3737_s29 + $0x8] sm:$0xff]  }
 0xbdd   : > { %v2060_v56 = vpop.xlane.xlu1 %2059 }
 0xbde   : > { %3206 = vrcp.f32 %v2060_v56 }
 0xbdf   : > { %3208 = vrcp.f32 %v2066_v46  ;;  %v2321_v46 = vunpack.c.l.bf16 %v3220_v57 }
 0xbe0   : > { %3210 = vrcp.f32 %v2063_v34 }
 0xbe1   : > { %v2075_v47 = vpop.xlane.xlu0 %2074  ;;  %v2102_v27 = vpop.permute.xlu1 %2101 }
 0xbe4   : > { %v3205_v59 = vpop.eup %3204 }
 0xbe5   : > { %v2069_v58 = vpop.xlane.xlu0 %2068  ;;  %v2080_v52 = vmul.f32 %v3205_v59, %v4109_v53  ;;  %v2104_v37 = vpop.permute.xlu1 %2103 }
 0xbe8   : > { %v3207_v23 = vpop.eup %3206 }
 0xbe9   : > { %v2100_v11 = vpop.permute.xlu0 %2099  ;;  %v2082_v7 = vmul.f32 %v3207_v23, %v3195_v41  ;;  %v3209_v8 = vpop.eup %3208  ;;  %v2322_v23 = vunpack.c.h.bf16 %v3220_v57 }
 0xbea   : > { %2892 = vmatprep.subr.bf16.mxu0 %v2100_v11  ;;  %v3211_v44 = vpop.eup %3210  ;;  %v2086_v36 = vmul.f32 %v3209_v8, %v4111_v38 }
 0xbeb   : > { %2893 = vmatpush3.bf16.msra.mxu0 %v2100_v11  ;;  %v2095_v12 = vpack.c.bf16 %v2082_v7, %v2080_v52  ;;  %v2084_v0 = vmul.f32 %v3211_v44, %v4105_v20 }
 0xbec   : > { %2894 = vmatprep.subr.bf16.mxu0 %v2102_v27 }
 0xbed   : > { %2900 = vmatprep.mubr.msk.bf16.mxu0 %vm1148_vm1, %v2095_v12  ;;  %v2096_v1 = vpack.c.bf16 %v2086_v36, %v2084_v0  ;;  %v2197_v41 = vpop.permute.xlu0 %2196 }
 0xbee   : > { %v2284_v12 = vsel %vm1058_vm0, %v3885_v22, %v2197_v41 }
 0xbef   : > { %2895 = vmatpush3.bf16.msra.mxu0 %v2102_v27 }
 0xbf0   : > { %2896 = vmatprep.subr.bf16.mxu0 %v2104_v37 }
 0xbf3   : > { %2897 = vmatpush3.bf16.msra.mxu0 %v2104_v37 }
 0xc16   : > { %v2078_v54 = vpop.xlane.xlu1 %2077 }
 0xc17   : > { %3212 = vrcp.f32 %v2078_v54 }
 0xc18   : > { %3214 = vrcp.f32 %v2069_v58 }
 0xc19   : > { %3216 = vrcp.f32 %v2075_v47 }
 0xc1a   : > { %v2072_v48 = vpop.xlane.xlu1 %2071 }
 0xc1b   : > { %3218 = vrcp.f32 %v2072_v48 }
 0xc1e   : > { %v2106_v63 = vpop.permute.xlu1 %2105 }
 0xc1f   : > { %2898 = vmatprep.subr.bf16.mxu0 %v2106_v63 }
 0xc20   : > { %2899 = vmatpush3.bf16.msra.mxu0 %v2106_v63 }
 0xc21   : > { %v3213_v2 = vpop.eup %3212 }
 0xc22   : > { %v3215_v3 = vpop.eup %3214  ;;  %v2094_v16 = vmul.f32 %v3213_v2, %v3201_v25  ;;  %v2199_v10 = vpop.permute.xlu1 %2198 }
 0xc23   : > { %2901 = vmatmul.mubr.msk.bf16.vlgmr.msra.gmra.mrb[40].mxu0 %vm1148_vm1, %v2096_v1  ;;  %v3217_v5 = vpop.eup %3216  ;;  %v2088_v17 = vmul.f32 %v3215_v3, %v4122_v43  ;;  %v2285_v36 = vsel %vm1058_vm0, %v3889_v28, %v2199_v10 }
 0xc24   : > { %v2092_v6 = vmul.f32 %v3217_v5, %v4118_v42  ;;  %v2201_v42 = vpop.permute.xlu0 %2200 }
 0xc25   : > { %v3219_v13 = vpop.eup %3218  ;;  %v2286_v34 = vsel %vm1058_vm0, %v3883_v26, %v2201_v42  ;;  %v3221_v26 = vld [vmem:[%s3737_s29] sm:$0xff]  }
 0xc26   : > { %v2090_v18 = vmul.f32 %v3219_v13, %v3203_v50  ;;  %v2098_v19 = vpack.c.bf16 %v2094_v16, %v2092_v6  ;;  %v2203_v51 = vpop.permute.xlu1 %2202  ;;  %v2319_v7 = vunpack.c.l.bf16 %v3221_v26  ;;  %v2320_v44 = vunpack.c.h.bf16 %v3221_v26  ;;  %v3222_v16 = vld [vmem:[%s3737_s29 + $0x10] sm:$0xff]  }
 0xc27   : > { %v2287_v58 = vsel %vm1058_vm0, %v3887_v29, %v2203_v51 }
 0xc28   : > { %v2097_v15 = vpack.c.bf16 %v2090_v18, %v2088_v17  ;;  %v2205_v43 = vpop.permute.xlu0 %2204  ;;  %v2323_v17 = vunpack.c.l.bf16 %v3222_v16 }
 0xc29   : > { %v2288_v28 = vsel %vm1058_vm0, %v3893_v31, %v2205_v43 }
 0xc2a   : > { %2904 = vmatprep.mubr.msk.bf16.mxu0 %vm1148_vm1, %v2097_v15  ;;  %v2207_v45 = vpop.permute.xlu1 %2206 }
 0xc2b   : > { %2905 = vmatmul.mubr.msk.bf16.gmra.mrb[44].mxu0 %vm1148_vm1, %v2098_v19  ;;  %v2289_v19 = vsel %vm1058_vm0, %v3897_v33, %v2207_v45  ;;  %v3223_v33 = vld [vmem:[%s3737_s29 + $0x18] sm:$0xff]   ;;  %s2357_s29 = sshll.u32 %s4193_s25, 4  ;;  %s4238_s29 = int_to_ptr.vmem [resolvable:$true] %s2357_s29 }
 0xc2c   : > { %v2209_v39 = vpop.permute.xlu0 %2208  ;;  %v2326_v45 = vunpack.c.h.bf16 %v3223_v33  ;;  %s3366_s18 = scalar_lea.vmem %s4238_s29, 1024  ;;  %p3373_p12 = scmp.lt.s32.totalorder %s4238_s29, %s3371_s23 }
 0xc2d   : > { %p3367_p3 = scmp.ne.s32.totalorder %s4238_s29, %s3366_s18  ;;  %p3374_p1 = scmp.lt.s32.totalorder %s3372_s21, %s3366_s18 }
 0xc2e   : > { %v4171_v49 = vpop.permute.xlu1 %2210 }
 0xc2f   : > { %v2291_v51 = vsel %vm1058_vm0, %v3895_v32, %v4171_v49  ;;  %p3368_p5 = pnand %p3367_p3, %p3678_p10  ;;  %p3375_p2 = por %p3374_p1, %p3373_p12 }
 0xc30   : > { %v2229_v60 = vpop.permute.xlu0 %2228 }
 0xc31   : > { %v2293_v8 = vsel %vm2292_vm3, %v2284_v12, %v2229_v60  ;;  %p3369_p7 = pneg %p3368_p5 }
 0xc32   : > { %v2231_v61 = vpop.permute.xlu1 %2230 }
 0xc33   : > { %v2294_v0 = vsel %vm2292_vm3, %v2285_v36, %v2231_v61  ;;  %p3376_p13 = pnand %p3375_p2, %p3369_p7 }
 0xc34   : > { %v2233_v62 = vpop.permute.xlu0 %2232 }
 0xc35   : > { %v2295_v56 = vsel %vm2292_vm3, %v2286_v34, %v2233_v62 }
 0xc36   : > { %v2235_v24 = vpop.permute.xlu1 %2234 }
 0xc37   : > { %v2296_v27 = vsel %vm2292_vm3, %v2287_v58, %v2235_v24 }
 0xc38   : > { %v2237_v25 = vpop.permute.xlu0 %2236 }
 0xc39   : > { %v2297_v18 = vsel %vm2292_vm3, %v2288_v28, %v2237_v25 }
 0xc3a   : > { %v2239_v35 = vpop.permute.xlu1 %2238 }
 0xc3c   : > { %v2241_v50 = vpop.permute.xlu0 %2240 }
 0xc3e   : > { %v4173_v55 = vpop.permute.xlu1 %2242 }
 0xcf6   : > { %v2902_v20 = vpop.f32.mrb[40].mxu0 }
 0xcf7   : > { %2264 = vrot.lane.b32.xlu0 %v2902_v20, %s3454_s15  ;;  %v2157_v14 = vpop.f32.mrb[41].mxu0 }
 0xcf8   : > { %v2903_v21 = vpop.f32.mrb[42].mxu0 }
 0xcf9   : > { %2266 = vrot.lane.b32.xlu1 %v2903_v21, %s3454_s15  ;;  %v2160_v4 = vpop.f32.mrb[43].mxu0  ;;  %v2298_v21 = vsel %vm2292_vm3, %v2289_v19, %v2239_v35 }
 0xcfb   : > { %2260 = vrot.lane.b32.xlu0 %v2157_v14, %s3454_s15  ;;  %v2324_v14 = vunpack.c.h.bf16 %v3222_v16 }
 0xcfd   : > { %2262 = vrot.lane.b32.xlu1 %v2160_v4, %s3454_s15 }
 0xcfe   : > { %v2906_v53 = vpop.f32.mrb[44].mxu0 }
 0xcff   : > { %v2173_v38 = vpop.f32.mrb[45].mxu0 }
 0xd00   : > { %2268 = vrot.lane.b32.xlu0 %v2173_v38, %s3454_s15  ;;  %v2907_v9 = vpop.f32.mrb[46].mxu0 }
 0xd01   : > { %v2176_v40 = vpop.f32.mrb[47].mxu0 }
 0xd02   : > { %2270 = vrot.lane.b32.xlu1 %v2176_v40, %s3454_s15  ;;  %v2325_v40 = vunpack.c.l.bf16 %v3223_v33 }
 0xd04   : > { %2272 = vrot.lane.b32.xlu0 %v2906_v53, %s3454_s15  ;;  %v2290_v53 = vsel %vm1058_vm0, %v3891_v30, %v2209_v39  ;;  %v2300_v39 = vsel %vm2292_vm3, %v2291_v51, %v4173_v55 }
 0xd05   : > { %v2299_v41 = vsel %vm2292_vm3, %v2290_v53, %v2241_v50 }
 0xd06   : > { %2274 = vrot.lane.b32.xlu1 %v2907_v9, %s3454_s15 }
 0xd69   : > { %v2265_v47 = vpop.permute.xlu0 %2264 }
 0xd6a   : > { %v2304_v59 = vsel %vm2301_vm2, %v2295_v56, %v2265_v47 }
 0xd6b   : > { %v2313_v11 = vsel %vm2310_vm4, %v2304_v59, 0.0  ;;  %v2267_v52 = vpop.permute.xlu1 %2266 }
 0xd6c   : > { %v2329_v37 = vadd.f32 %v2321_v46, %v2313_v11  ;;  %v2305_v54 = vsel %vm2301_vm2, %v2296_v27, %v2267_v52 }
 0xd6d   : > { %v2314_v29 = vsel %vm2310_vm4, %v2305_v54, 0.0  ;;  %v2261_v48 = vpop.permute.xlu0 %2260 }
 0xd6e   : > { %2337 = vst [vmem:[%s4193_s25 + $0x10] sm:$0xff] %v2329_v37  ;;  %v2330_v22 = vadd.f32 %v2322_v23, %v2314_v29  ;;  %v2302_v63 = vsel %vm2301_vm2, %v2293_v8, %v2261_v48 }
 0xd6f   : > { %v2311_v1 = vsel %vm2310_vm4, %v2302_v63, 0.0  ;;  %v2263_v2 = vpop.permute.xlu1 %2262 }
 0xd70   : > { %2338 = vst [vmem:[%s4193_s25 + $0x18] sm:$0xff] %v2330_v22  ;;  %v2327_v3 = vadd.f32 %v2319_v7, %v2311_v1  ;;  %v2303_v5 = vsel %vm2301_vm2, %v2294_v0, %v2263_v2 }
 0xd71   : > { %v2312_v13 = vsel %vm2310_vm4, %v2303_v5, 0.0 }
 0xd72   : > { %2335 = vst [vmem:[%s4193_s25] sm:$0xff] %v2327_v3  ;;  %v2328_v6 = vadd.f32 %v2320_v44, %v2312_v13  ;;  %v2269_v15 = vpop.permute.xlu0 %2268 }
 0xd73   : > { %v2306_v20 = vsel %vm2301_vm2, %v2297_v18, %v2269_v15 }
 0xd74   : > { %2336 = vst [vmem:[%s4193_s25 + $0x8] sm:$0xff] %v2328_v6  ;;  %v2315_v31 = vsel %vm2310_vm4, %v2306_v20, 0.0  ;;  %v2271_v4 = vpop.permute.xlu1 %2270 }
 0xd75   : > { %v2331_v38 = vadd.f32 %v2323_v17, %v2315_v31  ;;  %v2307_v9 = vsel %vm2301_vm2, %v2298_v21, %v2271_v4 }
 0xd76   : > { %v2316_v10 = vsel %vm2310_vm4, %v2307_v9, 0.0  ;;  %v2273_v42 = vpop.permute.xlu0 %2272 }
 0xd77   : > { %2339 = vst [vmem:[%s4193_s25 + $0x20] sm:$0xff] %v2331_v38  ;;  %v2332_v43 = vadd.f32 %v2324_v14, %v2316_v10  ;;  %v2308_v30 = vsel %vm2301_vm2, %v2299_v41, %v2273_v42 }
 0xd78   : > { %v2317_v60 = vsel %vm2310_vm4, %v2308_v30, 0.0  ;;  %v2275_v61 = vpop.permute.xlu1 %2274 }
 0xd79   : > { %2340 = vst [vmem:[%s4193_s25 + $0x28] sm:$0xff] %v2332_v43  ;;  %v2333_v62 = vadd.f32 %v2325_v40, %v2317_v60  ;;  %v2309_v32 = vsel %vm2301_vm2, %v2300_v39, %v2275_v61 }
 0xd7a   : > { %v2318_v49 = vsel %vm2310_vm4, %v2309_v32, 0.0 }
 0xd7b   : > { %2341 = vst [vmem:[%s4193_s25 + $0x30] sm:$0xff] %v2333_v62  ;;  %v2334_v24 = vadd.f32 %v2326_v45, %v2318_v49 }
 0xd7d   : > { %2342 = vst [vmem:[%s4193_s25 + $0x38] sm:$0xff] %v2334_v24 }
 0xd7e   : > { %3379 = shalt.err (!%p3376_p13)
}
 0xd7f   : > { %s3380_s15 = scalar_lea.hbm %s4235_s20, 1024  ;;  %s3384_s26 = scalar_lea.hbm %s4317_s9, 2048 }
 0xd80   : > { %p3381_p9 = scmp.ne.s32.totalorder %s4235_s20, %s3380_s15  ;;  %p3385_p4 = scmp.lt.u32.totalorder %s4235_s20, %s4317_s9 }
 0xd81   : > { %p3386_p8 = scmp.lt.u32.totalorder %s3384_s26, %s3380_s15  ;;  %p3388_p3 = scmp.lt.u32.totalorder %s3380_s15, %s4235_s20 }
 0xd82   : > { %p3382_p0 = pnand %p3381_p9, %p3678_p10 }
 0xd83   : > { %p3387_p6 = por %p3386_p8, %p3385_p4 }
 0xd84   : > { %p3383_p11 = pneg %p3382_p0 }
 0xd85   : > { %p3389_p5 = por %p3388_p3, %p3387_p6 }
 0xd87   : > { %p3390_p7 = pnand %p3389_p5, %p3383_p11 }
 0xd89   : > { %3393 = shalt.err (!%p3390_p7)
}
 0xd8a   : > { %s3456_s18 = smov 128  }
 0xd8b   : > { %2942 = dma.vmem_to_hbm [thread:$0]  (%p3678_p10), %s4238_s29, 1024, %s4235_s20, %s2344_s13, %s3456_s18, %s3456_s18, %s3453_s24  }
 0xd8c PF: > { %s4318_s16 = sld [smem:[#allocation16_spill]]  ;;  %s4319_s23 = sld [smem:[#allocation17_spill]] }
 0xd8d   : > { %p4321_p1 = scmp.ge.s32.totalorder %s3440_s12, 2 }
 0xd92   : > { %s2372_s21 = sand.u32 1, %s4318_s16   ;;  %p4320_p12 = scmp.ne.s32.totalorder %s4319_s23, 0 }
 0xd93   : > { %s2373_s15 = scalar_lea.sflag [#allocation4], %s2372_s21 }
 0xd94   : > { %p2962_p2 = pnand %p4321_p1, %p4320_p12 }
 0xd96   : > { %3423 = dma.done.wait (!%p2962_p2), %s2373_s15, 1024  }
 0xd97   : > { %3425 = vsyncadd (!%p2962_p2), %s2373_s15, 4294966272  ;;  %p24_p13 = scmp.ge.s32.totalorder %s3668_s14, 4   ;;  %s4322_s30 = smov %s3432_s10 }
 0xd98   : > { %s4323_s10 = smov %s3436_s11  ;;  %s4324_s11 = smov %s3684_s28 }
 0xd99   : > { %s4325_s12 = smov %s3668_s14  ;;  %26 = sbr.rel (!%p24_p13) target bundleno = 9 (0x9), region = 117 }
 0xda0   :  { %2378 = vsyncpa [#allocation3], 1 }
 0xda1   :  { %2380 = vsyncpa [#allocation3 + $0x1], 1 }
 0xda2   :  { %2381 = vsyncpa [#allocation6], 1 }
 0xda3   :  { %2382 = vsyncpa [#allocation9], 1 }
 0xda4   :  { %2383 = vsyncpa [#allocation4], 1 }
 0xda5   :  { %2385 = vsyncpa [#allocation4 + $0x1], 1 }

</bundles_post_ra>
